<compile_context>
chip_gen: v5e
topology: v5e:2x2
jax: 0.10.0
libtpu: 0.0.40
codegen_flags: <defaults>
</compile_context>

<pallas_src>
import jax
import jax.numpy as jnp
from jax.experimental import pallas as pl
from jax.experimental.pallas import tpu as pltpu


def _round_up(x, m):
    return ((x + m - 1) // m) * m


def simclr_kernel(x1_ref, x2_ref, wb_ref, bb_ref, w1_ref, b1_ref, w2_ref, b2_ref,
                  z1_ref, z2_ref, h_ref):
    tb = x1_ref.shape[0]

    # --- backbone (pool folded into fc): h_v = relu(x_v @ Wb_exp + bb) ------
    # x_v is the flattened (TB, C*HW) view; Wb_exp already carries the 1/HW
    # average-pool.  K = C*HW is lane-dense, MXU accumulates in f32.
    h1 = jnp.dot(x1_ref[...].astype(jnp.bfloat16), wb_ref[...],
                 preferred_element_type=jnp.float32) + bb_ref[...]
    h_ref[0:tb, :] = jnp.maximum(h1, 0.0)
    h2 = jnp.dot(x2_ref[...].astype(jnp.bfloat16), wb_ref[...],
                 preferred_element_type=jnp.float32) + bb_ref[...]
    h_ref[tb:2 * tb, :] = jnp.maximum(h2, 0.0)

    # --- projector: Linear(fc, fc) -> ReLU -> Linear(fc, emb), M = 2*TB -----
    p = jnp.dot(h_ref[...].astype(jnp.bfloat16), w1_ref[...],
                preferred_element_type=jnp.float32) + b1_ref[...]
    p = jnp.maximum(p, 0.0)
    z = jnp.dot(p.astype(jnp.bfloat16), w2_ref[...],
                preferred_element_type=jnp.float32) + b2_ref[...]

    z1_ref[...] = z[0:tb].astype(z1_ref.dtype)
    z2_ref[...] = z[tb:2 * tb].astype(z2_ref.dtype)


def _pad2(a, rows, cols):
    return jnp.pad(a, ((0, rows - a.shape[0]), (0, cols - a.shape[1])))


def _vmem_budget_bytes():
    """Generation-aware VMEM budget (<=75% of physical, capped at 96 MiB)."""
    cap = None
    try:
        info = pltpu.get_tpu_info()
        cap = getattr(info, "vmem_capacity_bytes", None)
    except Exception:
        cap = None
    if not cap:
        cap = 64 * 1024 * 1024          # conservative default (v7x per-TC VMEM)
    return int(min(int(cap) * 3 // 4, 96 * 1024 * 1024))


def _choose_batch_tile(B_aligned, K, fc_pad, emb_pad, weight_bytes, vmem_limit):
    """Largest sublane/MXU-aligned batch tile that fits the VMEM budget."""
    margin = 2 * 1024 * 1024
    # Bytes that scale linearly with TB:
    #   2 views   x 2 pipeline buffers x (TB, K)       f32 inputs
    #   2 outputs x 2 pipeline buffers x (TB, emb_pad) f32
    #   (2*TB, fc_pad) f32 hidden-feature scratch
    per_row = 2 * 2 * K * 4 + 2 * 2 * emb_pad * 4 + 2 * fc_pad * 4
    avail = vmem_limit - margin - weight_bytes
    tb = max(avail // per_row, 8)
    tb = int(min(tb, 1024, B_aligned))
    if tb >= 128:
        tb = (tb // 128) * 128          # 2*TB multiple of 256 -> full MXU M granule
    else:
        tb = max(8, (tb // 8) * 8)      # sublane aligned -> no tile-crossing slices
    # Megacore (v7x): ensure >=2 grid tiles whenever the batch allows so both
    # TensorCores get work under dimension_semantics=("parallel",).
    if tb >= B_aligned and B_aligned >= 16:
        tb = max(8, _round_up((B_aligned + 1) // 2, 8))
    return tb


def _build_call(TB, num_tiles, Bp, K, fc_pad, emb_pad, vmem_limit, single_buffer_weights):
    # Weight operands have constant index maps; single-buffering them halves
    # their resident VMEM (important for v7x's smaller VMEM).
    wmode = {"pipeline_mode": pl.Buffered(1)} if single_buffer_weights else {}
    grid_spec = pltpu.PrefetchScalarGridSpec(
        num_scalar_prefetch=0,
        grid=(num_tiles,),
        in_specs=[
            pl.BlockSpec((TB, K), lambda i: (i, 0)),                       # view 1 (flat)
            pl.BlockSpec((TB, K), lambda i: (i, 0)),                       # view 2 (flat)
            pl.BlockSpec((K, fc_pad), lambda i: (0, 0), **wmode),          # Wb_exp (bf16)
            pl.BlockSpec((1, fc_pad), lambda i: (0, 0), **wmode),          # bb
            pl.BlockSpec((fc_pad, fc_pad), lambda i: (0, 0), **wmode),     # W1 (bf16)
            pl.BlockSpec((1, fc_pad), lambda i: (0, 0), **wmode),          # b1
            pl.BlockSpec((fc_pad, emb_pad), lambda i: (0, 0), **wmode),    # W2 (bf16)
            pl.BlockSpec((1, emb_pad), lambda i: (0, 0), **wmode),         # b2
        ],
        out_specs=[
            pl.BlockSpec((TB, emb_pad), lambda i: (i, 0)),
            pl.BlockSpec((TB, emb_pad), lambda i: (i, 0)),
        ],
        scratch_shapes=[pltpu.VMEM((2 * TB, fc_pad), jnp.float32)],        # fused-view h
    )
    return pl.pallas_call(
        simclr_kernel,
        out_shape=(
            jax.ShapeDtypeStruct((Bp, emb_pad), jnp.float32),
            jax.ShapeDtypeStruct((Bp, emb_pad), jnp.float32),
        ),
        grid_spec=grid_spec,
        compiler_params=pltpu.CompilerParams(
            dimension_semantics=("parallel",),       # batch tiles independent (2 TCs on v7x)
            vmem_limit_bytes=vmem_limit,
        ),
    )


def simclr_forward(x_1, x_2, params):
    """x_1, x_2: [B, C, H, W] float32 (NCHW). Returns (z_1, z_2): [B, emb_dim]."""
    wb, bb, w1, b1, w2, b2 = (params[k] for k in ("wb", "bb", "w1", "b1", "w2", "b2"))
    B, C, H, W = x_1.shape
    HW = H * W
    K = C * HW
    fc_dim = wb.shape[1]
    emb_dim = w2.shape[1]

    # lane-dense padded widths (zero padding -> exact result after slicing)
    fc_pad = _round_up(max(fc_dim, 128), 128)
    emb_pad = _round_up(max(emb_dim, 128), 128)

    # Fold the 1/HW average-pool into the backbone fc weight by repeating each
    # channel row HW times (rows beyond K and padded columns are zero).
    wb_exp = _pad2(jnp.repeat(wb / float(HW), HW, axis=0), K, fc_pad).astype(jnp.bfloat16)
    bb_p = _pad2(bb, 1, fc_pad).astype(jnp.float32)
    w1_p = _pad2(w1, fc_pad, fc_pad).astype(jnp.bfloat16)
    b1_p = _pad2(b1, 1, fc_pad).astype(jnp.float32)
    w2_p = _pad2(w2, fc_pad, emb_pad).astype(jnp.bfloat16)
    b2_p = _pad2(b2, 1, emb_pad).astype(jnp.float32)

    # Flatten views to (B, C*HW): free contiguous reshape, fully lane-dense K.
    x1f = x_1.reshape(B, K)
    x2f = x_2.reshape(B, K)

    vmem_limit = _vmem_budget_bytes()
    # Conservative (double-buffered) weight footprint so the tile choice is
    # valid whether or not weight single-buffering compiles.
    weight_bytes = (2 * 2 * (K * fc_pad + fc_pad * fc_pad + fc_pad * emb_pad)
                    + 2 * 4 * (2 * fc_pad + emb_pad))
    TB = _choose_batch_tile(_round_up(B, 8), K, fc_pad, emb_pad, weight_bytes, vmem_limit)
    num_tiles = -(-B // TB)
    Bp = num_tiles * TB
    if Bp != B:
        x1f = jnp.pad(x1f, ((0, Bp - B), (0, 0)))
        x2f = jnp.pad(x2f, ((0, Bp - B), (0, 0)))

    args = (x1f, x2f, wb_exp, bb_p, w1_p, b1_p, w2_p, b2_p)
    z1 = z2 = None
    last_err = None
    for single_buf in (True, False):
        try:
            call = _build_call(TB, num_tiles, Bp, K, fc_pad, emb_pad, vmem_limit, single_buf)
            z1, z2 = call(*args)
            break
        except Exception as e:          # fall back to default double-buffered weights
            last_err = e
            z1 = z2 = None
    if z1 is None:
        raise last_err

    return z1[:B, :emb_dim], z2[:B, :emb_dim]


def _reference_forward(x_1, x_2, params):
    """Pure-JAX f32 reference matching the module semantics."""
    def one(x):
        B, C, H, W = x.shape
        feat = jnp.mean(x.reshape(B, C, H * W), axis=-1)
        h = jnp.maximum(feat @ params["wb"] + params["bb"], 0.0)
        p = jnp.maximum(h @ params["w1"] + params["b1"], 0.0)
        return p @ params["w2"] + params["b2"]
    return one(x_1), one(x_2)


def init_params(key, C, fc_dim, emb_dim):
    ks = jax.random.split(key, 6)
    scale = 0.1
    return {
        "wb": scale * jax.random.normal(ks[0], (C, fc_dim), jnp.float32),
        "bb": scale * jax.random.normal(ks[1], (1, fc_dim), jnp.float32),
        "w1": scale * jax.random.normal(ks[2], (fc_dim, fc_dim), jnp.float32),
        "b1": scale * jax.random.normal(ks[3], (1, fc_dim), jnp.float32),
        "w2": scale * jax.random.normal(ks[4], (fc_dim, emb_dim), jnp.float32),
        "b2": scale * jax.random.normal(ks[5], (1, emb_dim), jnp.float32),
    }


if __name__ == "__main__":
    B, C, H, W = 2, 4, 16, 16
    fc_dim, emb_dim = 32, 16

    key = jax.random.PRNGKey(0)
    k_x1, k_x2, k_p = jax.random.split(key, 3)
    x_1 = jax.random.normal(k_x1, (B, C, H, W), jnp.float32)
    x_2 = jax.random.normal(k_x2, (B, C, H, W), jnp.float32)
    params = init_params(k_p, C, fc_dim, emb_dim)

    z_1, z_2 = simclr_forward(x_1, x_2, params)
    jax.block_until_ready((z_1, z_2))

    r_1, r_2 = _reference_forward(x_1, x_2, params)
    # bf16 MXU operands with f32 accumulation -> slightly looser tolerance
    assert z_1.shape == (B, emb_dim) and z_2.shape == (B, emb_dim)
    assert jnp.allclose(z_1, r_1, atol=2e-2, rtol=2e-2), "z_1 mismatch vs reference"
    assert jnp.allclose(z_2, r_2, atol=2e-2, rtol=2e-2), "z_2 mismatch vs reference"

    print("KERNEL_OK")
</pallas_src>

<mosaic_0001>
module attributes {stable_mosaic.version = 11 : i64} {
  func.func @simclr_kernel(%arg0: i32, %arg1: memref<8x1024xf32, #tpu.memory_space<vmem>>, %arg2: memref<8x1024xf32, #tpu.memory_space<vmem>>, %arg3: memref<1024x128xbf16, #tpu.memory_space<vmem>>, %arg4: memref<1x128xf32, #tpu.memory_space<vmem>>, %arg5: memref<128x128xbf16, #tpu.memory_space<vmem>>, %arg6: memref<1x128xf32, #tpu.memory_space<vmem>>, %arg7: memref<128x128xbf16, #tpu.memory_space<vmem>>, %arg8: memref<1x128xf32, #tpu.memory_space<vmem>>, %arg9: memref<8x128xf32, #tpu.memory_space<vmem>>, %arg10: memref<8x128xf32, #tpu.memory_space<vmem>>, %arg11: memref<16x128xf32, #tpu.memory_space<vmem>>) attributes {dimension_semantics = [#tpu.dimension_semantics<parallel>], iteration_bounds = array<i64: 1>, scalar_prefetch = 0 : i64, scratch_operands = 1 : i64, tpu.core_type = #tpu.core_type<tc>, window_params = [{transform_indices = @transform_0, window_bounds = array<i64: 8, 1024>}, {transform_indices = @transform_1, window_bounds = array<i64: 8, 1024>}, {pipeline_mode = #tpu.pipeline_mode<synchronous>, transform_indices = @transform_2, window_bounds = array<i64: 1024, 128>}, {pipeline_mode = #tpu.pipeline_mode<synchronous>, transform_indices = @transform_3, window_bounds = array<i64: 1, 128>}, {pipeline_mode = #tpu.pipeline_mode<synchronous>, transform_indices = @transform_4, window_bounds = array<i64: 128, 128>}, {pipeline_mode = #tpu.pipeline_mode<synchronous>, transform_indices = @transform_5, window_bounds = array<i64: 1, 128>}, {pipeline_mode = #tpu.pipeline_mode<synchronous>, transform_indices = @transform_6, window_bounds = array<i64: 128, 128>}, {pipeline_mode = #tpu.pipeline_mode<synchronous>, transform_indices = @transform_7, window_bounds = array<i64: 1, 128>}, {transform_indices = @transform_8, window_bounds = array<i64: 8, 128>}, {transform_indices = @transform_9, window_bounds = array<i64: 8, 128>}]} {
    %c0 = arith.constant 0 : index
    %c0_0 = arith.constant 0 : index
    %0 = vector.load %arg1[%c0, %c0_0] : memref<8x1024xf32, #tpu.memory_space<vmem>>, vector<8x1024xf32>
    %1 = arith.truncf %0 : vector<8x1024xf32> to vector<8x1024xbf16>
    %c0_1 = arith.constant 0 : index
    %c0_2 = arith.constant 0 : index
    %2 = vector.load %arg3[%c0_1, %c0_2] : memref<1024x128xbf16, #tpu.memory_space<vmem>>, vector<1024x128xbf16>
    %cst = arith.constant dense<0.000000e+00> : vector<8x128xf32>
    %3 = tpu.matmul %1, %2, %cst {dimension_numbers = #tpu.dot_dimension_numbers<[1], [0], [0], [1], [0, 0, 1, 1], [], []>} : vector<8x1024xbf16>, vector<1024x128xbf16>, vector<8x128xf32> -> vector<8x128xf32>
    %c0_3 = arith.constant 0 : index
    %c0_4 = arith.constant 0 : index
    %4 = vector.load %arg4[%c0_3, %c0_4] : memref<1x128xf32, #tpu.memory_space<vmem>>, vector<1x128xf32>
    %5 = vector.broadcast %4 : vector<1x128xf32> to vector<8x128xf32>
    %6 = arith.addf %3, %5 : vector<8x128xf32>
    %cst_5 = arith.constant 0.000000e+00 : f32
    %7 = vector.broadcast %cst_5 : f32 to vector<8x128xf32>
    %8 = arith.maximumf %6, %7 : vector<8x128xf32>
    %c0_6 = arith.constant 0 : index
    %c0_7 = arith.constant 0 : index
    %9 = vector.load %arg11[%c0_6, %c0_7] : memref<16x128xf32, #tpu.memory_space<vmem>>, vector<8x128xf32>
    tpu.vector_store %arg11[%c0_6, %c0_7], %8 {strides = array<i32>} : memref<16x128xf32, #tpu.memory_space<vmem>>, vector<8x128xf32>,
    %c0_8 = arith.constant 0 : index
    %c0_9 = arith.constant 0 : index
    %10 = vector.load %arg2[%c0_8, %c0_9] : memref<8x1024xf32, #tpu.memory_space<vmem>>, vector<8x1024xf32>
    %11 = arith.truncf %10 : vector<8x1024xf32> to vector<8x1024xbf16>
    %c0_10 = arith.constant 0 : index
    %c0_11 = arith.constant 0 : index
    %12 = vector.load %arg3[%c0_10, %c0_11] : memref<1024x128xbf16, #tpu.memory_space<vmem>>, vector<1024x128xbf16>
    %cst_12 = arith.constant dense<0.000000e+00> : vector<8x128xf32>
    %13 = tpu.matmul %11, %12, %cst_12 {dimension_numbers = #tpu.dot_dimension_numbers<[1], [0], [0], [1], [0, 0, 1, 1], [], []>} : vector<8x1024xbf16>, vector<1024x128xbf16>, vector<8x128xf32> -> vector<8x128xf32>
    %c0_13 = arith.constant 0 : index
    %c0_14 = arith.constant 0 : index
    %14 = vector.load %arg4[%c0_13, %c0_14] : memref<1x128xf32, #tpu.memory_space<vmem>>, vector<1x128xf32>
    %15 = vector.broadcast %14 : vector<1x128xf32> to vector<8x128xf32>
    %16 = arith.addf %13, %15 : vector<8x128xf32>
    %cst_15 = arith.constant 0.000000e+00 : f32
    %17 = vector.broadcast %cst_15 : f32 to vector<8x128xf32>
    %18 = arith.maximumf %16, %17 : vector<8x128xf32>
    %c8 = arith.constant 8 : index
    %c0_16 = arith.constant 0 : index
    %19 = vector.load %arg11[%c8, %c0_16] : memref<16x128xf32, #tpu.memory_space<vmem>>, vector<8x128xf32>
    tpu.vector_store %arg11[%c8, %c0_16], %18 {strides = array<i32>} : memref<16x128xf32, #tpu.memory_space<vmem>>, vector<8x128xf32>,
    %c0_17 = arith.constant 0 : index
    %c0_18 = arith.constant 0 : index
    %20 = vector.load %arg11[%c0_17, %c0_18] : memref<16x128xf32, #tpu.memory_space<vmem>>, vector<16x128xf32>
    %21 = arith.truncf %20 : vector<16x128xf32> to vector<16x128xbf16>
    %c0_19 = arith.constant 0 : index
    %c0_20 = arith.constant 0 : index
    %22 = vector.load %arg5[%c0_19, %c0_20] : memref<128x128xbf16, #tpu.memory_space<vmem>>, vector<128x128xbf16>
    %cst_21 = arith.constant dense<0.000000e+00> : vector<16x128xf32>
    %23 = tpu.matmul %21, %22, %cst_21 {dimension_numbers = #tpu.dot_dimension_numbers<[1], [0], [0], [1], [0, 0, 1, 1], [], []>} : vector<16x128xbf16>, vector<128x128xbf16>, vector<16x128xf32> -> vector<16x128xf32>
    %c0_22 = arith.constant 0 : index
    %c0_23 = arith.constant 0 : index
    %24 = vector.load %arg6[%c0_22, %c0_23] : memref<1x128xf32, #tpu.memory_space<vmem>>, vector<1x128xf32>
    %25 = vector.broadcast %24 : vector<1x128xf32> to vector<16x128xf32>
    %26 = arith.addf %23, %25 : vector<16x128xf32>
    %cst_24 = arith.constant 0.000000e+00 : f32
    %27 = vector.broadcast %cst_24 : f32 to vector<16x128xf32>
    %28 = arith.maximumf %26, %27 : vector<16x128xf32>
    %29 = arith.truncf %28 : vector<16x128xf32> to vector<16x128xbf16>
    %c0_25 = arith.constant 0 : index
    %c0_26 = arith.constant 0 : index
    %30 = vector.load %arg7[%c0_25, %c0_26] : memref<128x128xbf16, #tpu.memory_space<vmem>>, vector<128x128xbf16>
    %cst_27 = arith.constant dense<0.000000e+00> : vector<16x128xf32>
    %31 = tpu.matmul %29, %30, %cst_27 {dimension_numbers = #tpu.dot_dimension_numbers<[1], [0], [0], [1], [0, 0, 1, 1], [], []>} : vector<16x128xbf16>, vector<128x128xbf16>, vector<16x128xf32> -> vector<16x128xf32>
    %c0_28 = arith.constant 0 : index
    %c0_29 = arith.constant 0 : index
    %32 = vector.load %arg8[%c0_28, %c0_29] : memref<1x128xf32, #tpu.memory_space<vmem>>, vector<1x128xf32>
    %33 = vector.broadcast %32 : vector<1x128xf32> to vector<16x128xf32>
    %34 = arith.addf %31, %33 : vector<16x128xf32>
    %35 = vector.extract_strided_slice %34 {offsets = [0, 0], sizes = [8, 128], strides = [1, 1]} : vector<16x128xf32> to vector<8x128xf32>
    %c0_30 = arith.constant 0 : index
    %c0_31 = arith.constant 0 : index
    %36 = vector.load %arg9[%c0_30, %c0_31] : memref<8x128xf32, #tpu.memory_space<vmem>>, vector<8x128xf32>
    tpu.vector_store %arg9[%c0_30, %c0_31], %35 {strides = array<i32>} : memref<8x128xf32, #tpu.memory_space<vmem>>, vector<8x128xf32>,
    %37 = vector.extract_strided_slice %34 {offsets = [8, 0], sizes = [8, 128], strides = [1, 1]} : vector<16x128xf32> to vector<8x128xf32>
    %c0_32 = arith.constant 0 : index
    %c0_33 = arith.constant 0 : index
    %38 = vector.load %arg10[%c0_32, %c0_33] : memref<8x128xf32, #tpu.memory_space<vmem>>, vector<8x128xf32>
    tpu.vector_store %arg10[%c0_32, %c0_33], %37 {strides = array<i32>} : memref<8x128xf32, #tpu.memory_space<vmem>>, vector<8x128xf32>,
    return
  }
  func.func @transform_0(%arg0: i32) -> (i32, i32) {
    %c0_i32 = arith.constant 0 : i32
    %c0_i32_0 = arith.constant 0 : i32
    return %arg0, %c0_i32 : i32, i32
  }
  func.func @transform_1(%arg0: i32) -> (i32, i32) {
    %c0_i32 = arith.constant 0 : i32
    %c0_i32_0 = arith.constant 0 : i32
    return %arg0, %c0_i32 : i32, i32
  }
  func.func @transform_2(%arg0: i32) -> (i32, i32) {
    %c0_i32 = arith.constant 0 : i32
    %c0_i32_0 = arith.constant 0 : i32
    %c0_i32_1 = arith.constant 0 : i32
    return %c0_i32, %c0_i32_0 : i32, i32
  }
  func.func @transform_3(%arg0: i32) -> (i32, i32) {
    %c0_i32 = arith.constant 0 : i32
    %c0_i32_0 = arith.constant 0 : i32
    %c0_i32_1 = arith.constant 0 : i32
    return %c0_i32, %c0_i32_0 : i32, i32
  }
  func.func @transform_4(%arg0: i32) -> (i32, i32) {
    %c0_i32 = arith.constant 0 : i32
    %c0_i32_0 = arith.constant 0 : i32
    %c0_i32_1 = arith.constant 0 : i32
    return %c0_i32, %c0_i32_0 : i32, i32
  }
  func.func @transform_5(%arg0: i32) -> (i32, i32) {
    %c0_i32 = arith.constant 0 : i32
    %c0_i32_0 = arith.constant 0 : i32
    %c0_i32_1 = arith.constant 0 : i32
    return %c0_i32, %c0_i32_0 : i32, i32
  }
  func.func @transform_6(%arg0: i32) -> (i32, i32) {
    %c0_i32 = arith.constant 0 : i32
    %c0_i32_0 = arith.constant 0 : i32
    %c0_i32_1 = arith.constant 0 : i32
    return %c0_i32, %c0_i32_0 : i32, i32
  }
  func.func @transform_7(%arg0: i32) -> (i32, i32) {
    %c0_i32 = arith.constant 0 : i32
    %c0_i32_0 = arith.constant 0 : i32
    %c0_i32_1 = arith.constant 0 : i32
    return %c0_i32, %c0_i32_0 : i32, i32
  }
  func.func @transform_8(%arg0: i32) -> (i32, i32) {
    %c0_i32 = arith.constant 0 : i32
    %c0_i32_0 = arith.constant 0 : i32
    return %arg0, %c0_i32 : i32, i32
  }
  func.func @transform_9(%arg0: i32) -> (i32, i32) {
    %c0_i32 = arith.constant 0 : i32
    %c0_i32_0 = arith.constant 0 : i32
    return %arg0, %c0_i32 : i32, i32
  }
}

module attributes {stable_mosaic.version = 11 : i64} {
  func.func @simclr_kernel(%arg0: i32, %arg1: memref<8x1024xf32, #tpu.memory_space<vmem>>, %arg2: memref<8x1024xf32, #tpu.memory_space<vmem>>, %arg3: memref<1024x128xbf16, #tpu.memory_space<vmem>>, %arg4: memref<1x128xf32, #tpu.memory_space<vmem>>, %arg5: memref<128x128xbf16, #tpu.memory_space<vmem>>, %arg6: memref<1x128xf32, #tpu.memory_space<vmem>>, %arg7: memref<128x128xbf16, #tpu.memory_space<vmem>>, %arg8: memref<1x128xf32, #tpu.memory_space<vmem>>, %arg9: memref<8x128xf32, #tpu.memory_space<vmem>>, %arg10: memref<8x128xf32, #tpu.memory_space<vmem>>, %arg11: memref<16x128xf32, #tpu.memory_space<vmem>>) attributes {dimension_semantics = [#tpu.dimension_semantics<parallel>], iteration_bounds = array<i64: 1>, scalar_prefetch = 0 : i64, scratch_operands = 1 : i64, tpu.core_type = #tpu.core_type<tc>, window_params = [{transform_indices = @transform_0, window_bounds = array<i64: 8, 1024>}, {transform_indices = @transform_1, window_bounds = array<i64: 8, 1024>}, {pipeline_mode = #tpu.pipeline_mode<synchronous>, transform_indices = @transform_2, window_bounds = array<i64: 1024, 128>}, {pipeline_mode = #tpu.pipeline_mode<synchronous>, transform_indices = @transform_3, window_bounds = array<i64: 1, 128>}, {pipeline_mode = #tpu.pipeline_mode<synchronous>, transform_indices = @transform_4, window_bounds = array<i64: 128, 128>}, {pipeline_mode = #tpu.pipeline_mode<synchronous>, transform_indices = @transform_5, window_bounds = array<i64: 1, 128>}, {pipeline_mode = #tpu.pipeline_mode<synchronous>, transform_indices = @transform_6, window_bounds = array<i64: 128, 128>}, {pipeline_mode = #tpu.pipeline_mode<synchronous>, transform_indices = @transform_7, window_bounds = array<i64: 1, 128>}, {transform_indices = @transform_8, window_bounds = array<i64: 8, 128>}, {transform_indices = @transform_9, window_bounds = array<i64: 8, 128>}]} {
    %c0 = arith.constant 0 : index
    %c0_0 = arith.constant 0 : index
    %0 = vector.load %arg1[%c0, %c0_0] : memref<8x1024xf32, #tpu.memory_space<vmem>>, vector<8x1024xf32>
    %1 = arith.truncf %0 : vector<8x1024xf32> to vector<8x1024xbf16>
    %c0_1 = arith.constant 0 : index
    %c0_2 = arith.constant 0 : index
    %2 = vector.load %arg3[%c0_1, %c0_2] : memref<1024x128xbf16, #tpu.memory_space<vmem>>, vector<1024x128xbf16>
    %cst = arith.constant dense<0.000000e+00> : vector<8x128xf32>
    %3 = tpu.matmul %1, %2, %cst {dimension_numbers = #tpu.dot_dimension_numbers<[1], [0], [0], [1], [0, 0, 1, 1], [], []>} : vector<8x1024xbf16>, vector<1024x128xbf16>, vector<8x128xf32> -> vector<8x128xf32>
    %c0_3 = arith.constant 0 : index
    %c0_4 = arith.constant 0 : index
    %4 = vector.load %arg4[%c0_3, %c0_4] : memref<1x128xf32, #tpu.memory_space<vmem>>, vector<1x128xf32>
    %5 = vector.broadcast %4 : vector<1x128xf32> to vector<8x128xf32>
    %6 = arith.addf %3, %5 : vector<8x128xf32>
    %cst_5 = arith.constant 0.000000e+00 : f32
    %7 = vector.broadcast %cst_5 : f32 to vector<8x128xf32>
    %8 = arith.maximumf %6, %7 : vector<8x128xf32>
    %c0_6 = arith.constant 0 : index
    %c0_7 = arith.constant 0 : index
    %9 = vector.load %arg11[%c0_6, %c0_7] : memref<16x128xf32, #tpu.memory_space<vmem>>, vector<8x128xf32>
    tpu.vector_store %arg11[%c0_6, %c0_7], %8 {strides = array<i32>} : memref<16x128xf32, #tpu.memory_space<vmem>>, vector<8x128xf32>,
    %c0_8 = arith.constant 0 : index
    %c0_9 = arith.constant 0 : index
    %10 = vector.load %arg2[%c0_8, %c0_9] : memref<8x1024xf32, #tpu.memory_space<vmem>>, vector<8x1024xf32>
    %11 = arith.truncf %10 : vector<8x1024xf32> to vector<8x1024xbf16>
    %c0_10 = arith.constant 0 : index
    %c0_11 = arith.constant 0 : index
    %12 = vector.load %arg3[%c0_10, %c0_11] : memref<1024x128xbf16, #tpu.memory_space<vmem>>, vector<1024x128xbf16>
    %cst_12 = arith.constant dense<0.000000e+00> : vector<8x128xf32>
    %13 = tpu.matmul %11, %12, %cst_12 {dimension_numbers = #tpu.dot_dimension_numbers<[1], [0], [0], [1], [0, 0, 1, 1], [], []>} : vector<8x1024xbf16>, vector<1024x128xbf16>, vector<8x128xf32> -> vector<8x128xf32>
    %c0_13 = arith.constant 0 : index
    %c0_14 = arith.constant 0 : index
    %14 = vector.load %arg4[%c0_13, %c0_14] : memref<1x128xf32, #tpu.memory_space<vmem>>, vector<1x128xf32>
    %15 = vector.broadcast %14 : vector<1x128xf32> to vector<8x128xf32>
    %16 = arith.addf %13, %15 : vector<8x128xf32>
    %cst_15 = arith.constant 0.000000e+00 : f32
    %17 = vector.broadcast %cst_15 : f32 to vector<8x128xf32>
    %18 = arith.maximumf %16, %17 : vector<8x128xf32>
    %c8 = arith.constant 8 : index
    %c0_16 = arith.constant 0 : index
    %19 = vector.load %arg11[%c8, %c0_16] : memref<16x128xf32, #tpu.memory_space<vmem>>, vector<8x128xf32>
    tpu.vector_store %arg11[%c8, %c0_16], %18 {strides = array<i32>} : memref<16x128xf32, #tpu.memory_space<vmem>>, vector<8x128xf32>,
    %c0_17 = arith.constant 0 : index
    %c0_18 = arith.constant 0 : index
    %20 = vector.load %arg11[%c0_17, %c0_18] : memref<16x128xf32, #tpu.memory_space<vmem>>, vector<16x128xf32>
    %21 = arith.truncf %20 : vector<16x128xf32> to vector<16x128xbf16>
    %c0_19 = arith.constant 0 : index
    %c0_20 = arith.constant 0 : index
    %22 = vector.load %arg5[%c0_19, %c0_20] : memref<128x128xbf16, #tpu.memory_space<vmem>>, vector<128x128xbf16>
    %cst_21 = arith.constant dense<0.000000e+00> : vector<16x128xf32>
    %23 = tpu.matmul %21, %22, %cst_21 {dimension_numbers = #tpu.dot_dimension_numbers<[1], [0], [0], [1], [0, 0, 1, 1], [], []>} : vector<16x128xbf16>, vector<128x128xbf16>, vector<16x128xf32> -> vector<16x128xf32>
    %c0_22 = arith.constant 0 : index
    %c0_23 = arith.constant 0 : index
    %24 = vector.load %arg6[%c0_22, %c0_23] : memref<1x128xf32, #tpu.memory_space<vmem>>, vector<1x128xf32>
    %25 = vector.broadcast %24 : vector<1x128xf32> to vector<16x128xf32>
    %26 = arith.addf %23, %25 : vector<16x128xf32>
    %cst_24 = arith.constant 0.000000e+00 : f32
    %27 = vector.broadcast %cst_24 : f32 to vector<16x128xf32>
    %28 = arith.maximumf %26, %27 : vector<16x128xf32>
    %29 = arith.truncf %28 : vector<16x128xf32> to vector<16x128xbf16>
    %c0_25 = arith.constant 0 : index
    %c0_26 = arith.constant 0 : index
    %30 = vector.load %arg7[%c0_25, %c0_26] : memref<128x128xbf16, #tpu.memory_space<vmem>>, vector<128x128xbf16>
    %cst_27 = arith.constant dense<0.000000e+00> : vector<16x128xf32>
    %31 = tpu.matmul %29, %30, %cst_27 {dimension_numbers = #tpu.dot_dimension_numbers<[1], [0], [0], [1], [0, 0, 1, 1], [], []>} : vector<16x128xbf16>, vector<128x128xbf16>, vector<16x128xf32> -> vector<16x128xf32>
    %c0_28 = arith.constant 0 : index
    %c0_29 = arith.constant 0 : index
    %32 = vector.load %arg8[%c0_28, %c0_29] : memref<1x128xf32, #tpu.memory_space<vmem>>, vector<1x128xf32>
    %33 = vector.broadcast %32 : vector<1x128xf32> to vector<16x128xf32>
    %34 = arith.addf %31, %33 : vector<16x128xf32>
    %35 = vector.extract_strided_slice %34 {offsets = [0, 0], sizes = [8, 128], strides = [1, 1]} : vector<16x128xf32> to vector<8x128xf32>
    %c0_30 = arith.constant 0 : index
    %c0_31 = arith.constant 0 : index
    %36 = vector.load %arg9[%c0_30, %c0_31] : memref<8x128xf32, #tpu.memory_space<vmem>>, vector<8x128xf32>
    tpu.vector_store %arg9[%c0_30, %c0_31], %35 {strides = array<i32>} : memref<8x128xf32, #tpu.memory_space<vmem>>, vector<8x128xf32>,
    %37 = vector.extract_strided_slice %34 {offsets = [8, 0], sizes = [8, 128], strides = [1, 1]} : vector<16x128xf32> to vector<8x128xf32>
    %c0_32 = arith.constant 0 : index
    %c0_33 = arith.constant 0 : index
    %38 = vector.load %arg10[%c0_32, %c0_33] : memref<8x128xf32, #tpu.memory_space<vmem>>, vector<8x128xf32>
    tpu.vector_store %arg10[%c0_32, %c0_33], %37 {strides = array<i32>} : memref<8x128xf32, #tpu.memory_space<vmem>>, vector<8x128xf32>,
    return
  }
  func.func @transform_0(%arg0: i32) -> (i32, i32) {
    %c0_i32 = arith.constant 0 : i32
    %c0_i32_0 = arith.constant 0 : i32
    return %arg0, %c0_i32 : i32, i32
  }
  func.func @transform_1(%arg0: i32) -> (i32, i32) {
    %c0_i32 = arith.constant 0 : i32
    %c0_i32_0 = arith.constant 0 : i32
    return %arg0, %c0_i32 : i32, i32
  }
  func.func @transform_2(%arg0: i32) -> (i32, i32) {
    %c0_i32 = arith.constant 0 : i32
    %c0_i32_0 = arith.constant 0 : i32
    %c0_i32_1 = arith.constant 0 : i32
    return %c0_i32, %c0_i32_0 : i32, i32
  }
  func.func @transform_3(%arg0: i32) -> (i32, i32) {
    %c0_i32 = arith.constant 0 : i32
    %c0_i32_0 = arith.constant 0 : i32
    %c0_i32_1 = arith.constant 0 : i32
    return %c0_i32, %c0_i32_0 : i32, i32
  }
  func.func @transform_4(%arg0: i32) -> (i32, i32) {
    %c0_i32 = arith.constant 0 : i32
    %c0_i32_0 = arith.constant 0 : i32
    %c0_i32_1 = arith.constant 0 : i32
    return %c0_i32, %c0_i32_0 : i32, i32
  }
  func.func @transform_5(%arg0: i32) -> (i32, i32) {
    %c0_i32 = arith.constant 0 : i32
    %c0_i32_0 = arith.constant 0 : i32
    %c0_i32_1 = arith.constant 0 : i32
    return %c0_i32, %c0_i32_0 : i32, i32
  }
  func.func @transform_6(%arg0: i32) -> (i32, i32) {
    %c0_i32 = arith.constant 0 : i32
    %c0_i32_0 = arith.constant 0 : i32
    %c0_i32_1 = arith.constant 0 : i32
    return %c0_i32, %c0_i32_0 : i32, i32
  }
  func.func @transform_7(%arg0: i32) -> (i32, i32) {
    %c0_i32 = arith.constant 0 : i32
    %c0_i32_0 = arith.constant 0 : i32
    %c0_i32_1 = arith.constant 0 : i32
    return %c0_i32, %c0_i32_0 : i32, i32
  }
  func.func @transform_8(%arg0: i32) -> (i32, i32) {
    %c0_i32 = arith.constant 0 : i32
    %c0_i32_0 = arith.constant 0 : i32
    return %arg0, %c0_i32 : i32, i32
  }
  func.func @transform_9(%arg0: i32) -> (i32, i32) {
    %c0_i32 = arith.constant 0 : i32
    %c0_i32_0 = arith.constant 0 : i32
    return %arg0, %c0_i32 : i32, i32
  }
}

</mosaic_0001>

<bundles_post_ra>
// kernel: tpu_custom_call.1
= control target key start
LH: loop header
LB: loop body
LE: loop exit
PB: predicated region body
PF: predicated region fallthrough
CT: control target
= control target key end

     0   :  { %15 = vsyncpa [#allocation4], 0  ;;  %s2593_s0 = inlined_call_operand.hbm [shape: f32[8,1024], index: 0, kind: input, shape index: {}]   ;;  %s2594_s1 = inlined_call_operand.hbm [shape: f32[8,1024], index: 1, kind: input, shape index: {}]   ;;  %s2595_s2 = inlined_call_operand.hbm [shape: bf16[1024,128], index: 2, kind: input, shape index: {}]   ;;  %s2596_s3 = inlined_call_operand.vmem [shape: f32[1,128], index: 3, kind: input, shape index: {}]   ;;  %s2597_s4 = inlined_call_operand.hbm [shape: bf16[128,128], index: 4, kind: input, shape index: {}]   ;;  %s2598_s5 = inlined_call_operand.vmem [shape: f32[1,128], index: 5, kind: input, shape index: {}]   ;;  %s2599_s6 = inlined_call_operand.hbm [shape: bf16[128,128], index: 6, kind: input, shape index: {}]   ;;  %s2600_s7 = inlined_call_operand.vmem [shape: f32[1,128], index: 7, kind: input, shape index: {}]   ;;  %s2601_s8 = inlined_call_operand.hbm [shape: f32[8,128], index: 8, kind: output, shape index: {0}]   ;;  %s2602_s9 = inlined_call_operand.hbm [shape: f32[8,128], index: 9, kind: output, shape index: {1}]  }
   0x1   :  { %16 = vsyncpa [#allocation7], 0 }
   0x2   :  { %17 = vsyncpa [#allocation10], 0 }
   0x3   :  { %18 = vsyncpa [#allocation5], 0  ;;  %s36_s11 = sshll.u32 %s2594_s1, 4  ;;  %s37_s11 = int_to_ptr.hbm [resolvable:$true] %s36_s11 }
   0x4   :  { %19 = vsyncpa [#allocation14], 0  ;;  %s2501_s12 = smov [#allocation6]   ;;  %s61_s16 = sshll.u32 %s2597_s4, 4  ;;  %s62_s16 = int_to_ptr.hbm [resolvable:$true] %s61_s16 }
   0x5   :  { %s38_s13 = sshll.u32 %s2501_s12, 4  ;;  %s2502_s17 = smov [#allocation9]   ;;  %s39_s13 = int_to_ptr.vmem [resolvable:$true] %s38_s13 }
   0x6   :  { %41 = dma.hbm_to_vmem [thread:$0]  %s37_s11, 1024, %s39_s13, [#allocation7]  }
   0x7   :  { %s63_s18 = sshll.u32 %s2502_s17, 4  ;;  %s25_s21 = sshll.u32 %s2593_s0, 4  ;;  %s64_s18 = int_to_ptr.vmem [resolvable:$true] %s63_s18  ;;  %s26_s21 = int_to_ptr.hbm [resolvable:$true] %s25_s21 }
   0x8   :  { %s2503_s1 = smov 64   ;;  %s2504_s22 = smov 4  }
   0x9   :  { %69 = dma.hbm_to_vmem [thread:$0]  %s62_s16, 1024, %s64_s18, [#allocation10], %s2503_s1, %s2503_s1, %s2504_s22  }
   0xa   :  { %s46_s25 = sshll.u32 %s2595_s2, 4  ;;  %s2505_s26 = smov [#allocation3]   ;;  %s47_s25 = int_to_ptr.hbm [resolvable:$true] %s46_s25 }
   0xb   :  { %s27_s27 = sshll.u32 %s2505_s26, 4  ;;  %s2506_s4 = smov [#allocation8]   ;;  %s28_s27 = int_to_ptr.vmem [resolvable:$true] %s27_s27 }
   0xc   :  { %30 = dma.hbm_to_vmem [thread:$0]  %s26_s21, 1024, %s28_s27, [#allocation4]  }
   0xd   :  { %s48_s28 = sshll.u32 %s2506_s4, 4  ;;  %s76_s0 = sshll.u32 %s2599_s6, 4  ;;  %s49_s28 = int_to_ptr.vmem [resolvable:$true] %s48_s28  ;;  %s77_s0 = int_to_ptr.hbm [resolvable:$true] %s76_s0 }
   0xe   :  { %54 = dma.hbm_to_vmem [thread:$0]  %s47_s25, 8192, %s49_s28, [#allocation7], %s2503_s1, %s2503_s1, %s2504_s22  }
   0xf   :  { %s2507_s10 = smov [#allocation11]  }
  0x10   :  { %s78_s11 = sshll.u32 %s2507_s10, 4  ;;  %s79_s11 = int_to_ptr.vmem [resolvable:$true] %s78_s11 }
  0x11   :  { %84 = dma.hbm_to_vmem [thread:$0]  %s77_s0, 1024, %s79_s11, [#allocation10], %s2503_s1, %s2503_s1, %s2504_s22  }
  0x12   :  { %2491 = dma.done.wait [#allocation4], 1024  }
  0x13   :  { %2492 = vsyncadd [#allocation4], 4294966272 }
  0x14   :  { %2493 = dma.done.wait [#allocation7], 9216  }
  0x15   :  { %2494 = vsyncadd [#allocation7], 4294958080 }
  0x16   :  { %2495 = dma.done.wait [#allocation10], 2048  }
  0x17   :  { %2496 = vsyncadd [#allocation10], 4294965248  ;;  %v2173_v0 = vld [vmem:[#allocation8 + $0x38] sm:$0xff]  ;;  %v2172_v4 = vld [vmem:[#allocation8 + $0x30] sm:$0xff]  ;;  %s2508_s17 = smov [#allocation12]   ;;  %s1562_s21 = sshll.u32 %s2601_s8, 4  ;;  %s1563_s21 = int_to_ptr.hbm [resolvable:$true] %s1562_s21 }
  0x18   :  { %v2181_v1 = vld [vmem:[#allocation8 + $0x78] sm:$0xff]  ;;  %639 = vmatpush.bf16.msra.mxu0 %v2173_v0  ;;  %v2180_v5 = vld [vmem:[#allocation8 + $0x70] sm:$0xff]  ;;  %v2171_v8 = vld [vmem:[#allocation8 + $0x28] sm:$0xff]  ;;  %s1560_s18 = sshll.u32 %s2508_s17, 4  ;;  %s1573_s24 = sshll.u32 %s2602_s9, 4  ;;  %s1561_s18 = int_to_ptr.vmem [resolvable:$true] %s1560_s18  ;;  %s1574_s24 = int_to_ptr.hbm [resolvable:$true] %s1573_s24 }
  0x19   :  { %v2189_v2 = vld [vmem:[#allocation8 + $0xb8] sm:$0xff]  ;;  %652 = vmatpush.bf16.msra.mxu1 %v2181_v1  ;;  %v2188_v6 = vld [vmem:[#allocation8 + $0xb0] sm:$0xff]  ;;  %v2179_v9 = vld [vmem:[#allocation8 + $0x68] sm:$0xff] }
  0x1a   :  { %v2197_v3 = vld [vmem:[#allocation8 + $0xf8] sm:$0xff]  ;;  %665 = vmatpush.bf16.msra.mxu2 %v2189_v2  ;;  %v2196_v7 = vld [vmem:[#allocation8 + $0xf0] sm:$0xff]  ;;  %v2187_v10 = vld [vmem:[#allocation8 + $0xa8] sm:$0xff] }
  0x1b   :  { %678 = vmatpush.bf16.msra.mxu3 %v2197_v3  ;;  %v2195_v11 = vld [vmem:[#allocation8 + $0xe8] sm:$0xff]  ;;  %v2170_v12 = vld [vmem:[#allocation8 + $0x20] sm:$0xff]  ;;  %v2169_v16 = vld [vmem:[#allocation8 + $0x18] sm:$0xff] }
  0x1c   :  { %640 = vmatpush.bf16.msra.mxu0 %v2172_v4  ;;  %v2178_v13 = vld [vmem:[#allocation8 + $0x60] sm:$0xff]  ;;  %v2177_v17 = vld [vmem:[#allocation8 + $0x58] sm:$0xff]  ;;  %v2168_v20 = vld [vmem:[#allocation8 + $0x10] sm:$0xff] }
  0x1d   :  { %653 = vmatpush.bf16.msra.mxu1 %v2180_v5  ;;  %v2186_v14 = vld [vmem:[#allocation8 + $0xa0] sm:$0xff]  ;;  %v2185_v18 = vld [vmem:[#allocation8 + $0x98] sm:$0xff]  ;;  %v2176_v21 = vld [vmem:[#allocation8 + $0x50] sm:$0xff] }
  0x1e   :  { %666 = vmatpush.bf16.msra.mxu2 %v2188_v6  ;;  %v2194_v15 = vld [vmem:[#allocation8 + $0xe0] sm:$0xff]  ;;  %v2193_v19 = vld [vmem:[#allocation8 + $0xd8] sm:$0xff]  ;;  %v2184_v22 = vld [vmem:[#allocation8 + $0x90] sm:$0xff] }
  0x1f   :  { %679 = vmatpush.bf16.msra.mxu3 %v2196_v7  ;;  %v2192_v23 = vld [vmem:[#allocation8 + $0xd0] sm:$0xff]  ;;  %v2167_v24 = vld [vmem:[#allocation8 + $0x8] sm:$0xff]  ;;  %v2166_v28 = vld [vmem:[#allocation8] sm:$0xff] }
  0x20   :  { %641 = vmatpush.bf16.msra.mxu0 %v2171_v8  ;;  %v2175_v25 = vld [vmem:[#allocation8 + $0x48] sm:$0xff]  ;;  %v2174_v29 = vld [vmem:[#allocation8 + $0x40] sm:$0xff]  ;;  %v2205_v32 = vld [vmem:[#allocation8 + $0x138] sm:$0xff] }
  0x21   :  { %654 = vmatpush.bf16.msra.mxu1 %v2179_v9  ;;  %v2183_v26 = vld [vmem:[#allocation8 + $0x88] sm:$0xff]  ;;  %v2182_v30 = vld [vmem:[#allocation8 + $0x80] sm:$0xff]  ;;  %v109_v33 = vld [vmem:[#allocation3 + $0x10] sm:$0xff] }
  0x22   :  { %667 = vmatpush.bf16.msra.mxu2 %v2187_v10  ;;  %v2191_v27 = vld [vmem:[#allocation8 + $0xc8] sm:$0xff]  ;;  %v2190_v31 = vld [vmem:[#allocation8 + $0xc0] sm:$0xff]  ;;  %v2213_v35 = vld [vmem:[#allocation8 + $0x178] sm:$0xff]  ;;  %v117_v40 = vpack.c.bf16 %v109_v33, %v109_v33 }
  0x23   :  { %680 = vmatpush.bf16.msra.mxu3 %v2195_v11  ;;  %v107_v34 = vld [vmem:[#allocation3] sm:$0xff]  ;;  %v110_v36 = vld [vmem:[#allocation3 + $0x18] sm:$0xff]  ;;  %v108_v37 = vld [vmem:[#allocation3 + $0x8] sm:$0xff] }
  0x24   :  { %642 = vmatpush.bf16.msra.mxu0 %v2170_v12  ;;  %v2221_v38 = vld [vmem:[#allocation8 + $0x1b8] sm:$0xff]  ;;  %v115_v41 = vpack.c.bf16 %v107_v34, %v107_v34  ;;  %v118_v42 = vpack.c.bf16 %v110_v36, %v110_v36  ;;  %v116_v43 = vpack.c.bf16 %v108_v37, %v108_v37  ;;  %v2204_v44 = vld [vmem:[#allocation8 + $0x130] sm:$0xff]  ;;  %v2203_v48 = vld [vmem:[#allocation8 + $0x128] sm:$0xff] }
  0x25   :  { %655 = vmatpush.bf16.msra.mxu1 %v2178_v13  ;;  %v2229_v39 = vld [vmem:[#allocation8 + $0x1f8] sm:$0xff]  ;;  %v2212_v45 = vld [vmem:[#allocation8 + $0x170] sm:$0xff]  ;;  %v2211_v49 = vld [vmem:[#allocation8 + $0x168] sm:$0xff] }
  0x26   :  { %668 = vmatpush.bf16.msra.mxu2 %v2186_v14  ;;  %v2220_v46 = vld [vmem:[#allocation8 + $0x1b0] sm:$0xff]  ;;  %v2219_v50 = vld [vmem:[#allocation8 + $0x1a8] sm:$0xff]  ;;  %v2202_v52 = vld [vmem:[#allocation8 + $0x120] sm:$0xff] }
  0x27   :  { %681 = vmatpush.bf16.msra.mxu3 %v2194_v15  ;;  %v2228_v47 = vld [vmem:[#allocation8 + $0x1f0] sm:$0xff]  ;;  %v2227_v51 = vld [vmem:[#allocation8 + $0x1e8] sm:$0xff]  ;;  %v2210_v53 = vld [vmem:[#allocation8 + $0x160] sm:$0xff] }
  0x28   :  { %643 = vmatpush.bf16.msra.mxu0 %v2169_v16  ;;  %v2218_v54 = vld [vmem:[#allocation8 + $0x1a0] sm:$0xff]  ;;  %v2201_v56 = vld [vmem:[#allocation8 + $0x118] sm:$0xff]  ;;  %v2200_v60 = vld [vmem:[#allocation8 + $0x110] sm:$0xff] }
  0x29   :  { %656 = vmatpush.bf16.msra.mxu1 %v2177_v17  ;;  %v2226_v55 = vld [vmem:[#allocation8 + $0x1e0] sm:$0xff]  ;;  %v2209_v57 = vld [vmem:[#allocation8 + $0x158] sm:$0xff]  ;;  %v2208_v61 = vld [vmem:[#allocation8 + $0x150] sm:$0xff] }
  0x2a   :  { %669 = vmatpush.bf16.msra.mxu2 %v2185_v18  ;;  %v2217_v58 = vld [vmem:[#allocation8 + $0x198] sm:$0xff]  ;;  %v2216_v62 = vld [vmem:[#allocation8 + $0x190] sm:$0xff]  ;;  %v2199_v0 = vld [vmem:[#allocation8 + $0x108] sm:$0xff] }
  0x2b   :  { %682 = vmatpush.bf16.msra.mxu3 %v2193_v19  ;;  %v2225_v59 = vld [vmem:[#allocation8 + $0x1d8] sm:$0xff]  ;;  %v2224_v63 = vld [vmem:[#allocation8 + $0x1d0] sm:$0xff]  ;;  %v2207_v1 = vld [vmem:[#allocation8 + $0x148] sm:$0xff] }
  0x2c   :  { %644 = vmatpush.bf16.msra.mxu0 %v2168_v20  ;;  %v2215_v2 = vld [vmem:[#allocation8 + $0x188] sm:$0xff]  ;;  %v2198_v4 = vld [vmem:[#allocation8 + $0x100] sm:$0xff]  ;;  %v2237_v8 = vld [vmem:[#allocation8 + $0x38] sm:$0xff] }
  0x2d   :  { %657 = vmatpush.bf16.msra.mxu1 %v2176_v21  ;;  %v2223_v3 = vld [vmem:[#allocation8 + $0x1c8] sm:$0xff]  ;;  %v2206_v5 = vld [vmem:[#allocation8 + $0x140] sm:$0xff]  ;;  %v113_v9 = vld [vmem:[#allocation3 + $0x30] sm:$0xff] }
  0x2e   :  { %670 = vmatpush.bf16.msra.mxu2 %v2184_v22  ;;  %v2214_v6 = vld [vmem:[#allocation8 + $0x180] sm:$0xff]  ;;  %v2245_v11 = vld [vmem:[#allocation8 + $0x78] sm:$0xff]  ;;  %v112_v13 = vld [vmem:[#allocation3 + $0x28] sm:$0xff]  ;;  %v121_v16 = vpack.c.bf16 %v113_v9, %v113_v9 }
  0x2f   :  { %683 = vmatpush.bf16.msra.mxu3 %v2192_v23  ;;  %v2222_v7 = vld [vmem:[#allocation8 + $0x1c0] sm:$0xff]  ;;  %v114_v12 = vld [vmem:[#allocation3 + $0x38] sm:$0xff]  ;;  %v120_v19 = vpack.c.bf16 %v112_v13, %v112_v13  ;;  %v2236_v20 = vld [vmem:[#allocation8 + $0x30] sm:$0xff] }
  0x30   :  { %645 = vmatpush.bf16.msra.mxu0 %v2167_v24  ;;  %v111_v10 = vld [vmem:[#allocation3 + $0x20] sm:$0xff]  ;;  %v2253_v14 = vld [vmem:[#allocation8 + $0xb8] sm:$0xff]  ;;  %v122_v18 = vpack.c.bf16 %v114_v12, %v114_v12  ;;  %v2244_v21 = vld [vmem:[#allocation8 + $0x70] sm:$0xff] }
  0x31   :  { %658 = vmatpush.bf16.msra.mxu1 %v2175_v25  ;;  %v2261_v15 = vld [vmem:[#allocation8 + $0xf8] sm:$0xff]  ;;  %v119_v17 = vpack.c.bf16 %v111_v10, %v111_v10  ;;  %v2252_v22 = vld [vmem:[#allocation8 + $0xb0] sm:$0xff]  ;;  %v2235_v24 = vld [vmem:[#allocation8 + $0x28] sm:$0xff] }
  0x32   :  { %671 = vmatpush.bf16.msra.mxu2 %v2183_v26  ;;  %v2260_v23 = vld [vmem:[#allocation8 + $0xf0] sm:$0xff]  ;;  %v2243_v25 = vld [vmem:[#allocation8 + $0x68] sm:$0xff]  ;;  %v2241_v33 = vld [vmem:[#allocation8 + $0x58] sm:$0xff] }
  0x33   :  { %684 = vmatpush.bf16.msra.mxu3 %v2191_v27  ;;  %v2251_v26 = vld [vmem:[#allocation8 + $0xa8] sm:$0xff]  ;;  %v2249_v34 = vld [vmem:[#allocation8 + $0x98] sm:$0xff]  ;;  %v2232_v36 = vld [vmem:[#allocation8 + $0x10] sm:$0xff] }
  0x34   :  { %646 = vmatpush.bf16.msra.mxu0 %v2166_v28  ;;  %v2259_v27 = vld [vmem:[#allocation8 + $0xe8] sm:$0xff]  ;;  %v2234_v28 = vld [vmem:[#allocation8 + $0x20] sm:$0xff]  ;;  %v2240_v37 = vld [vmem:[#allocation8 + $0x50] sm:$0xff] }
  0x35   :  { %659 = vmatpush.bf16.msra.mxu1 %v2174_v29  ;;  %v2242_v29 = vld [vmem:[#allocation8 + $0x60] sm:$0xff]  ;;  %v2273_v9 = vld [vmem:[#allocation8 + $0x158] sm:$0xff]  ;;  %v2264_v12 = vld [vmem:[#allocation8 + $0x110] sm:$0xff] }
  0x36   :  { %672 = vmatpush.bf16.msra.mxu2 %v2182_v30  ;;  %v2250_v30 = vld [vmem:[#allocation8 + $0xa0] sm:$0xff]  ;;  %v2281_v10 = vld [vmem:[#allocation8 + $0x198] sm:$0xff]  ;;  %v2272_v13 = vld [vmem:[#allocation8 + $0x150] sm:$0xff] }
  0x37   :  { %685 = vmatpush.bf16.msra.mxu3 %v2190_v31  ;;  %647 = vmatmul.bf16.vlgmr.msra.gmra.mxu0 %v115_v41  ;;  %v2258_v31 = vld [vmem:[#allocation8 + $0xe0] sm:$0xff]  ;;  %v2239_v41 = vld [vmem:[#allocation8 + $0x48] sm:$0xff] }
  0x38   :  { %691 = vmatpush.bf16.msrb.mxu0 %v2205_v32  ;;  %660 = vmatmul.bf16.vlgmr.msra.gmra.mxu1 %v116_v43  ;;  %v2233_v32 = vld [vmem:[#allocation8 + $0x18] sm:$0xff]  ;;  %v2255_v43 = vld [vmem:[#allocation8 + $0xc8] sm:$0xff] }
  0x39   :  { %704 = vmatpush.bf16.msrb.mxu1 %v2213_v35  ;;  %673 = vmatmul.bf16.vlgmr.msra.gmra.mxu2 %v117_v40  ;;  %v2257_v35 = vld [vmem:[#allocation8 + $0xd8] sm:$0xff]  ;;  %v2231_v40 = vld [vmem:[#allocation8 + $0x8] sm:$0xff] }
  0x3a   :  { %717 = vmatpush.bf16.msrb.mxu2 %v2221_v38  ;;  %686 = vmatmul.bf16.vlgmr.msra.gmra.mxu3 %v118_v42  ;;  %v2248_v38 = vld [vmem:[#allocation8 + $0x90] sm:$0xff]  ;;  %v2247_v42 = vld [vmem:[#allocation8 + $0x88] sm:$0xff] }
  0x3b   :  { %730 = vmatpush.bf16.msrb.mxu3 %v2229_v39  ;;  %v2256_v39 = vld [vmem:[#allocation8 + $0xd0] sm:$0xff] }
  0x3c   :  { %692 = vmatpush.bf16.msrb.mxu0 %v2204_v44  ;;  %v2230_v44 = vld [vmem:[#allocation8] sm:$0xff] }
  0x3d   :  { %705 = vmatpush.bf16.msrb.mxu1 %v2212_v45  ;;  %v2238_v45 = vld [vmem:[#allocation8 + $0x40] sm:$0xff] }
  0x3e   :  { %718 = vmatpush.bf16.msrb.mxu2 %v2220_v46  ;;  %v2246_v46 = vld [vmem:[#allocation8 + $0x80] sm:$0xff] }
  0x3f   :  { %731 = vmatpush.bf16.msrb.mxu3 %v2228_v47  ;;  %v2254_v47 = vld [vmem:[#allocation8 + $0xc0] sm:$0xff] }
  0x40   :  { %693 = vmatpush.bf16.msrb.mxu0 %v2203_v48  ;;  %v2269_v48 = vld [vmem:[#allocation8 + $0x138] sm:$0xff] }
  0x41   :  { %706 = vmatpush.bf16.msrb.mxu1 %v2211_v49  ;;  %v747_v49 = vld [vmem:[#allocation6 + $0x10] sm:$0xff] }
  0x42   :  { %719 = vmatpush.bf16.msrb.mxu2 %v2219_v50  ;;  %v745_v50 = vld [vmem:[#allocation6] sm:$0xff] }
  0x43   :  { %732 = vmatpush.bf16.msrb.mxu3 %v2227_v51  ;;  %v2277_v51 = vld [vmem:[#allocation8 + $0x178] sm:$0xff] }
  0x44   :  { %694 = vmatpush.bf16.msrb.mxu0 %v2202_v52  ;;  %v748_v52 = vld [vmem:[#allocation6 + $0x18] sm:$0xff] }
  0x45   :  { %707 = vmatpush.bf16.msrb.mxu1 %v2210_v53  ;;  %v746_v53 = vld [vmem:[#allocation6 + $0x8] sm:$0xff] }
  0x46   :  { %720 = vmatpush.bf16.msrb.mxu2 %v2218_v54  ;;  %v2285_v54 = vld [vmem:[#allocation8 + $0x1b8] sm:$0xff] }
  0x47   :  { %733 = vmatpush.bf16.msrb.mxu3 %v2226_v55  ;;  %v2293_v55 = vld [vmem:[#allocation8 + $0x1f8] sm:$0xff] }
  0x48   :  { %695 = vmatpush.bf16.msrb.mxu0 %v2201_v56  ;;  %v755_v56 = vpack.c.bf16 %v747_v49, %v747_v49  ;;  %v2301_v49 = vld [vmem:[#allocation9 + $0x38] sm:$0xff] }
  0x49   :  { %708 = vmatpush.bf16.msrb.mxu1 %v2209_v57  ;;  %v753_v57 = vpack.c.bf16 %v745_v50, %v745_v50 }
  0x4a   :  { %721 = vmatpush.bf16.msrb.mxu2 %v2217_v58  ;;  %v756_v58 = vpack.c.bf16 %v748_v52, %v748_v52  ;;  %v2300_v52 = vld [vmem:[#allocation9 + $0x30] sm:$0xff] }
  0x4b   :  { %734 = vmatpush.bf16.msrb.mxu3 %v2225_v59  ;;  %v754_v59 = vpack.c.bf16 %v746_v53, %v746_v53  ;;  %v2299_v53 = vld [vmem:[#allocation9 + $0x28] sm:$0xff] }
  0x4c   :  { %696 = vmatpush.bf16.msrb.mxu0 %v2200_v60  ;;  %v2268_v60 = vld [vmem:[#allocation8 + $0x130] sm:$0xff] }
  0x4d   :  { %709 = vmatpush.bf16.msrb.mxu1 %v2208_v61  ;;  %v2276_v61 = vld [vmem:[#allocation8 + $0x170] sm:$0xff] }
  0x4e   :  { %722 = vmatpush.bf16.msrb.mxu2 %v2216_v62  ;;  %v2284_v62 = vld [vmem:[#allocation8 + $0x1b0] sm:$0xff] }
  0x4f   :  { %735 = vmatpush.bf16.msrb.mxu3 %v2224_v63  ;;  %v2292_v63 = vld [vmem:[#allocation8 + $0x1f0] sm:$0xff] }
  0x50   :  { %697 = vmatpush.bf16.msrb.mxu0 %v2199_v0  ;;  %v2267_v0 = vld [vmem:[#allocation8 + $0x128] sm:$0xff] }
  0x51   :  { %710 = vmatpush.bf16.msrb.mxu1 %v2207_v1  ;;  %v2275_v1 = vld [vmem:[#allocation8 + $0x168] sm:$0xff] }
  0x52   :  { %723 = vmatpush.bf16.msrb.mxu2 %v2215_v2  ;;  %v2283_v2 = vld [vmem:[#allocation8 + $0x1a8] sm:$0xff] }
  0x53   :  { %736 = vmatpush.bf16.msrb.mxu3 %v2223_v3  ;;  %v2291_v3 = vld [vmem:[#allocation8 + $0x1e8] sm:$0xff] }
  0x54   :  { %698 = vmatpush.bf16.msrb.mxu0 %v2198_v4  ;;  %v2266_v4 = vld [vmem:[#allocation8 + $0x120] sm:$0xff] }
  0x55   :  { %711 = vmatpush.bf16.msrb.mxu1 %v2206_v5  ;;  %v2274_v5 = vld [vmem:[#allocation8 + $0x160] sm:$0xff] }
  0x56   :  { %724 = vmatpush.bf16.msrb.mxu2 %v2214_v6  ;;  %v2282_v6 = vld [vmem:[#allocation8 + $0x1a0] sm:$0xff] }
  0x57   :  { %737 = vmatpush.bf16.msrb.mxu3 %v2222_v7  ;;  %699 = vmatmul.bf16.vlgmr.msrb.gmra.mxu0 %v119_v17  ;;  %v2290_v7 = vld [vmem:[#allocation8 + $0x1e0] sm:$0xff]  ;;  %v2271_v17 = vld [vmem:[#allocation8 + $0x148] sm:$0xff] }
  0x58   :  { %1277 = vmatpush.bf16.msra.mxu0 %v2237_v8  ;;  %712 = vmatmul.bf16.vlgmr.msrb.gmra.mxu1 %v120_v19  ;;  %v2265_v8 = vld [vmem:[#allocation8 + $0x118] sm:$0xff]  ;;  %v2287_v19 = vld [vmem:[#allocation8 + $0x1c8] sm:$0xff] }
  0x59   :  { %1290 = vmatpush.bf16.msra.mxu1 %v2245_v11  ;;  %725 = vmatmul.bf16.vlgmr.msrb.gmra.mxu2 %v121_v16  ;;  %v2289_v11 = vld [vmem:[#allocation8 + $0x1d8] sm:$0xff]  ;;  %v2263_v16 = vld [vmem:[#allocation8 + $0x108] sm:$0xff] }
  0x5a   :  { %1303 = vmatpush.bf16.msra.mxu2 %v2253_v14  ;;  %738 = vmatmul.bf16.vlgmr.msrb.gmra.mxu3 %v122_v18  ;;  %v2280_v14 = vld [vmem:[#allocation8 + $0x190] sm:$0xff]  ;;  %v2279_v18 = vld [vmem:[#allocation8 + $0x188] sm:$0xff] }
  0x5b   :  { %1316 = vmatpush.bf16.msra.mxu3 %v2261_v15  ;;  %v2288_v15 = vld [vmem:[#allocation8 + $0x1d0] sm:$0xff] }
  0x5c   :  { %1278 = vmatpush.bf16.msra.mxu0 %v2236_v20  ;;  %v2262_v20 = vld [vmem:[#allocation8 + $0x100] sm:$0xff] }
  0x5d   :  { %1291 = vmatpush.bf16.msra.mxu1 %v2244_v21  ;;  %v2270_v21 = vld [vmem:[#allocation8 + $0x140] sm:$0xff] }
  0x5e   :  { %1304 = vmatpush.bf16.msra.mxu2 %v2252_v22  ;;  %v2278_v22 = vld [vmem:[#allocation8 + $0x180] sm:$0xff] }
  0x5f   :  { %1317 = vmatpush.bf16.msra.mxu3 %v2260_v23  ;;  %v749_v23 = vld [vmem:[#allocation6 + $0x20] sm:$0xff] }
  0x60   :  { %1279 = vmatpush.bf16.msra.mxu0 %v2235_v24  ;;  %v750_v24 = vld [vmem:[#allocation6 + $0x28] sm:$0xff] }
  0x61   :  { %1292 = vmatpush.bf16.msra.mxu1 %v2243_v25  ;;  %v2286_v25 = vld [vmem:[#allocation8 + $0x1c0] sm:$0xff] }
  0x62   :  { %1305 = vmatpush.bf16.msra.mxu2 %v2251_v26  ;;  %v751_v26 = vld [vmem:[#allocation6 + $0x30] sm:$0xff] }
  0x63   :  { %1318 = vmatpush.bf16.msra.mxu3 %v2259_v27  ;;  %v752_v27 = vld [vmem:[#allocation6 + $0x38] sm:$0xff] }
  0x64   :  { %1280 = vmatpush.bf16.msra.mxu0 %v2234_v28  ;;  %v757_v28 = vpack.c.bf16 %v749_v23, %v749_v23 }
  0x65   :  { %1293 = vmatpush.bf16.msra.mxu1 %v2242_v29  ;;  %v758_v29 = vpack.c.bf16 %v750_v24, %v750_v24 }
  0x66   :  { %1306 = vmatpush.bf16.msra.mxu2 %v2250_v30  ;;  %v759_v30 = vpack.c.bf16 %v751_v26, %v751_v26 }
  0x67   :  { %1319 = vmatpush.bf16.msra.mxu3 %v2258_v31  ;;  %v760_v31 = vpack.c.bf16 %v752_v27, %v752_v27 }
  0x68   :  { %1281 = vmatpush.bf16.msra.mxu0 %v2233_v32  ;;  %v2319_v32 = vld [vmem:[%s2596_s3] ss:$0 sm:$0xff] }
  0x69   :  { %1294 = vmatpush.bf16.msra.mxu1 %v2241_v33 }
  0x6a   :  { %1307 = vmatpush.bf16.msra.mxu2 %v2249_v34 }
  0x6b   :  { %1320 = vmatpush.bf16.msra.mxu3 %v2257_v35 }
  0x6c   :  { %1282 = vmatpush.bf16.msra.mxu0 %v2232_v36 }
  0x6d   :  { %1295 = vmatpush.bf16.msra.mxu1 %v2240_v37 }
  0x6e   :  { %1308 = vmatpush.bf16.msra.mxu2 %v2248_v38 }
  0x6f   :  { %1321 = vmatpush.bf16.msra.mxu3 %v2256_v39 }
  0x70   :  { %1283 = vmatpush.bf16.msra.mxu0 %v2231_v40 }
  0x71   :  { %1296 = vmatpush.bf16.msra.mxu1 %v2239_v41 }
  0x72   :  { %1309 = vmatpush.bf16.msra.mxu2 %v2247_v42 }
  0x73   :  { %1322 = vmatpush.bf16.msra.mxu3 %v2255_v43 }
  0x74   :  { %1284 = vmatpush.bf16.msra.mxu0 %v2230_v44 }
  0x75   :  { %1297 = vmatpush.bf16.msra.mxu1 %v2238_v45 }
  0x76   :  { %1310 = vmatpush.bf16.msra.mxu2 %v2246_v46 }
  0x77   :  { %1323 = vmatpush.bf16.msra.mxu3 %v2254_v47  ;;  %1285 = vmatmul.bf16.vlgmr.msra.gmra.mxu0 %v753_v57  ;;  %v2297_v57 = vld [vmem:[#allocation9 + $0x18] sm:$0xff] }
  0x78   :  { %1329 = vmatpush.bf16.msrb.mxu0 %v2269_v48  ;;  %1298 = vmatmul.bf16.vlgmr.msra.gmra.mxu1 %v754_v59  ;;  %v2296_v59 = vld [vmem:[#allocation9 + $0x10] sm:$0xff] }
  0x79   :  { %1342 = vmatpush.bf16.msrb.mxu1 %v2277_v51  ;;  %1311 = vmatmul.bf16.vlgmr.msra.gmra.mxu2 %v755_v56  ;;  %v2298_v56 = vld [vmem:[#allocation9 + $0x20] sm:$0xff] }
  0x7a   :  { %1355 = vmatpush.bf16.msrb.mxu2 %v2285_v54  ;;  %1324 = vmatmul.bf16.vlgmr.msra.gmra.mxu3 %v756_v58 }
  0x7b   :  { %1368 = vmatpush.bf16.msrb.mxu3 %v2293_v55 }
  0x7c   :  { %1330 = vmatpush.bf16.msrb.mxu0 %v2268_v60 }
  0x7d   :  { %1343 = vmatpush.bf16.msrb.mxu1 %v2276_v61  ;;  %v2295_v61 = vld [vmem:[#allocation9 + $0x8] sm:$0xff] }
  0x7e   :  { %1356 = vmatpush.bf16.msrb.mxu2 %v2284_v62 }
  0x7f   :  { %1369 = vmatpush.bf16.msrb.mxu3 %v2292_v63 }
  0x80   :  { %1331 = vmatpush.bf16.msrb.mxu0 %v2267_v0 }
  0x81   :  { %1344 = vmatpush.bf16.msrb.mxu1 %v2275_v1  ;;  %v2294_v1 = vld [vmem:[#allocation9] sm:$0xff] }
  0x82   :  { %1357 = vmatpush.bf16.msrb.mxu2 %v2283_v2 }
  0x83   :  { %1370 = vmatpush.bf16.msrb.mxu3 %v2291_v3  ;;  %v2320_v3 = vld [vmem:[%s2596_s3] ss:$0 sm:$0xff] }
  0x84   :  { %1332 = vmatpush.bf16.msrb.mxu0 %v2266_v4  ;;  %v2309_v4 = vld [vmem:[#allocation11 + $0x38] sm:$0xff] }
  0x85   :  { %1345 = vmatpush.bf16.msrb.mxu1 %v2274_v5 }
  0x86   :  { %1358 = vmatpush.bf16.msrb.mxu2 %v2282_v6 }
  0x87   :  { %1371 = vmatpush.bf16.msrb.mxu3 %v2290_v7  ;;  %v2308_v7 = vld [vmem:[#allocation11 + $0x30] sm:$0xff] }
  0x88   :  { %1333 = vmatpush.bf16.msrb.mxu0 %v2265_v8 }
  0x89   :  { %1346 = vmatpush.bf16.msrb.mxu1 %v2273_v9  ;;  %v2307_v9 = vld [vmem:[#allocation11 + $0x28] sm:$0xff] }
  0x8a   :  { %1359 = vmatpush.bf16.msrb.mxu2 %v2281_v10 }
  0x8b   :  { %1372 = vmatpush.bf16.msrb.mxu3 %v2289_v11  ;;  %v2306_v11 = vld [vmem:[#allocation11 + $0x20] sm:$0xff] }
  0x8c   :  { %1334 = vmatpush.bf16.msrb.mxu0 %v2264_v12 }
  0x8d   :  { %1347 = vmatpush.bf16.msrb.mxu1 %v2272_v13 }
  0x8e   :  { %1360 = vmatpush.bf16.msrb.mxu2 %v2280_v14 }
  0x8f   :  { %1373 = vmatpush.bf16.msrb.mxu3 %v2288_v15 }
  0x90   :  { %1335 = vmatpush.bf16.msrb.mxu0 %v2263_v16 }
  0x91   :  { %1348 = vmatpush.bf16.msrb.mxu1 %v2271_v17 }
  0x92   :  { %1361 = vmatpush.bf16.msrb.mxu2 %v2279_v18 }
  0x93   :  { %1374 = vmatpush.bf16.msrb.mxu3 %v2287_v19 }
  0x94   :  { %1336 = vmatpush.bf16.msrb.mxu0 %v2262_v20 }
  0x95   :  { %1349 = vmatpush.bf16.msrb.mxu1 %v2270_v21 }
  0x96   :  { %1362 = vmatpush.bf16.msrb.mxu2 %v2278_v22 }
  0x97   :  { %1375 = vmatpush.bf16.msrb.mxu3 %v2286_v25  ;;  %1337 = vmatmul.bf16.vlgmr.msrb.gmra.mxu0 %v757_v28 }
  0x98   :  { %1350 = vmatmul.bf16.vlgmr.msrb.gmra.mxu1 %v758_v29  ;;  %1454 = vmatpush.bf16.msra.mxu0 %v2301_v49 }
  0x99   :  { %1363 = vmatmul.bf16.vlgmr.msrb.gmra.mxu2 %v759_v30  ;;  %1539 = vmatpush.bf16.msra.mxu1 %v2309_v4 }
  0x9a   :  { %1376 = vmatmul.bf16.vlgmr.msrb.gmra.mxu3 %v760_v31 }
  0x9c   :  { %1455 = vmatpush.bf16.msra.mxu0 %v2300_v52 }
  0x9d   :  { %1540 = vmatpush.bf16.msra.mxu1 %v2308_v7 }
  0xa0   :  { %1456 = vmatpush.bf16.msra.mxu0 %v2299_v53 }
  0xa1   :  { %1541 = vmatpush.bf16.msra.mxu1 %v2307_v9 }
  0xa4   :  { %1457 = vmatpush.bf16.msra.mxu0 %v2298_v56 }
  0xa5   :  { %1542 = vmatpush.bf16.msra.mxu1 %v2306_v11 }
  0xa8   :  { %1458 = vmatpush.bf16.msra.mxu0 %v2297_v57 }
  0xac   :  { %1459 = vmatpush.bf16.msra.mxu0 %v2296_v59 }
  0xb0   :  { %1460 = vmatpush.bf16.msra.mxu0 %v2295_v61 }
  0xb4   :  { %v648_v33 = vpop.f32.mrf.mxu0  ;;  %1461 = vmatpush.bf16.msra.mxu0 %v2294_v1 }
  0xb5   :  { %v649_v34 = vadd.f32 %v2319_v32, %v648_v33  ;;  %v661_v35 = vpop.f32.mrf.mxu1  ;;  %v2305_v33 = vld [vmem:[#allocation11 + $0x18] sm:$0xff] }
  0xb6   :  { %1543 = vmatpush.bf16.msra.mxu1 %v2305_v33 }
  0xb7   :  { %v662_v36 = vadd.f32 %v661_v35, %v649_v34  ;;  %v2304_v34 = vld [vmem:[#allocation11 + $0x10] sm:$0xff]  ;;  %v2303_v35 = vld [vmem:[#allocation11 + $0x8] sm:$0xff] }
  0xba   :  { %1544 = vmatpush.bf16.msra.mxu1 %v2304_v34 }
  0xbc   :  { %v674_v37 = vpop.f32.mrf.mxu2  ;;  %v650_v40 = vpop.f32.mrf.mxu0 }
  0xbd   :  { %v675_v38 = vadd.f32 %v674_v37, %v662_v36  ;;  %v687_v39 = vpop.f32.mrf.mxu3  ;;  %v663_v42 = vpop.f32.mrf.mxu1  ;;  %v2302_v36 = vld [vmem:[#allocation11] sm:$0xff] }
  0xbe   :  { %1545 = vmatpush.bf16.msra.mxu1 %v2303_v35 }
  0xbf   :  { %v688_v41 = vadd.f32 %v687_v39, %v675_v38  ;;  %v2321_v38 = vld [vmem:[%s2598_s5] ss:$0 sm:$0xff]  ;;  %s2509_s5 = smov [#allocation13]  }
  0xc0   :  { %s1571_s1 = sshll.u32 %s2509_s5, 4  ;;  %s1572_s1 = int_to_ptr.vmem [resolvable:$true] %s1571_s1 }
  0xc2   :  { %1546 = vmatpush.bf16.msra.mxu1 %v2302_v36 }
  0xc4   :  { %v676_v43 = vpop.f32.mrf.mxu2 }
  0xc5   :  { %v689_v44 = vpop.f32.mrf.mxu3 }
  0xd4   :  { %v700_v45 = vpop.f32.mrf.mxu0 }
  0xd5   :  { %v713_v46 = vpop.f32.mrf.mxu1  ;;  %v701_v12 = vadd.f32 %v700_v45, %v688_v41  ;;  %v2322_v45 = vld [vmem:[%s2600_s7] ss:$0 sm:$0xff] }
  0xd7   :  { %v714_v14 = vadd.f32 %v713_v46, %v701_v12 }
  0xdc   :  { %v726_v47 = vpop.f32.mrf.mxu2  ;;  %v702_v50 = vpop.f32.mrf.mxu0 }
  0xdd   :  { %v739_v48 = vpop.f32.mrf.mxu3  ;;  %v715_v51 = vpop.f32.mrf.mxu1  ;;  %v727_v19 = vadd.f32 %v726_v47, %v714_v14 }
  0xdf   :  { %v740_v23 = vadd.f32 %v739_v48, %v727_v19 }
  0xe1   :  { %v743_v28 = vmax.f32 %v740_v23, 0.0 }
  0xe4   :  { %v728_v54 = vpop.f32.mrf.mxu2 }
  0xe5   :  { %v741_v55 = vpop.f32.mrf.mxu3 }
  0xf4   :  { %v1286_v58 = vpop.f32.mrf.mxu0 }
  0xf5   :  { %v1299_v60 = vpop.f32.mrf.mxu1  ;;  %v1287_v8 = vadd.f32 %v2320_v3, %v1286_v58 }
  0xf7   :  { %v1300_v10 = vadd.f32 %v1299_v60, %v1287_v8 }
  0xfc   :  { %v1312_v62 = vpop.f32.mrf.mxu2  ;;  %v1288_v0 = vpop.f32.mrf.mxu0 }
  0xfd   :  { %v1325_v63 = vpop.f32.mrf.mxu3  ;;  %v1301_v2 = vpop.f32.mrf.mxu1  ;;  %v1313_v13 = vadd.f32 %v1312_v62, %v1300_v10 }
  0xff   :  { %v1326_v15 = vadd.f32 %v1325_v63, %v1313_v13 }
 0x104   :  { %v1314_v5 = vpop.f32.mrf.mxu2 }
 0x105   :  { %v1327_v6 = vpop.f32.mrf.mxu3 }
 0x114   :  { %v1338_v16 = vpop.f32.mrf.mxu0 }
 0x115   :  { %v1351_v17 = vpop.f32.mrf.mxu1  ;;  %v1339_v18 = vadd.f32 %v1338_v16, %v1326_v15 }
 0x117   :  { %v1352_v20 = vadd.f32 %v1351_v17, %v1339_v18 }
 0x11c   :  { %v1364_v21 = vpop.f32.mrf.mxu2  ;;  %v1340_v25 = vpop.f32.mrf.mxu0 }
 0x11d   :  { %v1377_v22 = vpop.f32.mrf.mxu3  ;;  %v1365_v24 = vadd.f32 %v1364_v21, %v1352_v20  ;;  %v1353_v26 = vpop.f32.mrf.mxu1 }
 0x11f   :  { %v1378_v27 = vadd.f32 %v1377_v22, %v1365_v24 }
 0x121   :  { %v1381_v29 = vmax.f32 %v1378_v27, 0.0 }
 0x123   :  { %v1385_v30 = vpack.c.bf16 %v1381_v29, %v743_v28 }
 0x124   :  { %v1366_v31 = vpop.f32.mrf.mxu2 }
 0x125   :  { %v1379_v32 = vpop.f32.mrf.mxu3  ;;  %1462 = vmatmul.bf16.vlgmr.msra.gmra.mxu0 %v1385_v30 }
 0x1a2   :  { %v1463_v37 = vpop.f32.mrf.mxu0 }
 0x1a3   :  { %v1464_v39 = vadd.f32 %v2321_v38, %v1463_v37 }
 0x1a5   :  { %v1468_v42 = vmax.f32 %v1464_v39, 0.0 }
 0x1aa   :  { %v1465_v40 = vpop.f32.mrf.mxu0 }
 0x1ab   :  { %v1466_v41 = vadd.f32 %v2321_v38, %v1465_v40 }
 0x1ad   :  { %v1469_v43 = vmax.f32 %v1466_v41, 0.0 }
 0x1af   :  { %v1470_v44 = vpack.c.bf16 %v1469_v43, %v1468_v42 }
 0x1b1   :  { %1547 = vmatmul.bf16.vlgmr.msra.gmra.mxu1 %v1470_v44 }
 0x22e   :  { %v1548_v46 = vpop.f32.mrf.mxu1 }
 0x22f   :  { %v1549_v47 = vadd.f32 %v2322_v45, %v1548_v46 }
 0x231   :  { %1553 = vst [vmem:[#allocation12] sm:$0xff] %v1549_v47 }
 0x232   :  { %1565 = dma.vmem_to_hbm [thread:$0]  %s1561_s18, 128, %s1563_s21, [#allocation5]  }
 0x236   :  { %v1550_v48 = vpop.f32.mrf.mxu1 }
 0x237   :  { %v1551_v49 = vadd.f32 %v2322_v45, %v1550_v48 }
 0x239   :  { %1554 = vst [vmem:[#allocation13] sm:$0xff] %v1551_v49 }
 0x23a   :  { %1576 = dma.vmem_to_hbm [thread:$0]  %s1572_s1, 128, %s1574_s24, [#allocation14]  }
 0x23b   :  { %2497 = dma.done.wait [#allocation5], 128  }
 0x23c   :  { %2498 = vsyncadd [#allocation5], 4294967168 }
 0x23d   :  { %2499 = dma.done.wait [#allocation14], 128  }
 0x23e   :  { %2500 = vsyncadd [#allocation14], 4294967168 }
 0x23f   :  { %1585 = vsyncpa [#allocation4], 1 }
 0x240   :  { %1586 = vsyncpa [#allocation7], 1 }
 0x241   :  { %1587 = vsyncpa [#allocation10], 1 }
 0x242   :  { %1588 = vsyncpa [#allocation5], 1 }
 0x243   :  { %1589 = vsyncpa [#allocation14], 1 }

// kernel: tpu_custom_call.1
= control target key start
LH: loop header
LB: loop body
LE: loop exit
PB: predicated region body
PF: predicated region fallthrough
CT: control target
= control target key end

     0   :  { %15 = vsyncpa [#allocation4], 0  ;;  %s2593_s0 = inlined_call_operand.hbm [shape: f32[8,1024], index: 0, kind: input, shape index: {}]   ;;  %s2594_s1 = inlined_call_operand.hbm [shape: f32[8,1024], index: 1, kind: input, shape index: {}]   ;;  %s2595_s2 = inlined_call_operand.hbm [shape: bf16[1024,128], index: 2, kind: input, shape index: {}]   ;;  %s2596_s3 = inlined_call_operand.vmem [shape: f32[1,128], index: 3, kind: input, shape index: {}]   ;;  %s2597_s4 = inlined_call_operand.hbm [shape: bf16[128,128], index: 4, kind: input, shape index: {}]   ;;  %s2598_s5 = inlined_call_operand.vmem [shape: f32[1,128], index: 5, kind: input, shape index: {}]   ;;  %s2599_s6 = inlined_call_operand.hbm [shape: bf16[128,128], index: 6, kind: input, shape index: {}]   ;;  %s2600_s7 = inlined_call_operand.vmem [shape: f32[1,128], index: 7, kind: input, shape index: {}]   ;;  %s2601_s8 = inlined_call_operand.hbm [shape: f32[8,128], index: 8, kind: output, shape index: {0}]   ;;  %s2602_s9 = inlined_call_operand.hbm [shape: f32[8,128], index: 9, kind: output, shape index: {1}]  }
   0x1   :  { %16 = vsyncpa [#allocation7], 0 }
   0x2   :  { %17 = vsyncpa [#allocation10], 0 }
   0x3   :  { %18 = vsyncpa [#allocation5], 0  ;;  %s36_s11 = sshll.u32 %s2594_s1, 4  ;;  %s37_s11 = int_to_ptr.hbm [resolvable:$true] %s36_s11 }
   0x4   :  { %19 = vsyncpa [#allocation14], 0  ;;  %s2501_s12 = smov [#allocation6]   ;;  %s61_s16 = sshll.u32 %s2597_s4, 4  ;;  %s62_s16 = int_to_ptr.hbm [resolvable:$true] %s61_s16 }
   0x5   :  { %s38_s13 = sshll.u32 %s2501_s12, 4  ;;  %s2502_s17 = smov [#allocation9]   ;;  %s39_s13 = int_to_ptr.vmem [resolvable:$true] %s38_s13 }
   0x6   :  { %41 = dma.hbm_to_vmem [thread:$0]  %s37_s11, 1024, %s39_s13, [#allocation7]  }
   0x7   :  { %s63_s18 = sshll.u32 %s2502_s17, 4  ;;  %s25_s21 = sshll.u32 %s2593_s0, 4  ;;  %s64_s18 = int_to_ptr.vmem [resolvable:$true] %s63_s18  ;;  %s26_s21 = int_to_ptr.hbm [resolvable:$true] %s25_s21 }
   0x8   :  { %s2503_s1 = smov 64   ;;  %s2504_s22 = smov 4  }
   0x9   :  { %69 = dma.hbm_to_vmem [thread:$0]  %s62_s16, 1024, %s64_s18, [#allocation10], %s2503_s1, %s2503_s1, %s2504_s22  }
   0xa   :  { %s46_s25 = sshll.u32 %s2595_s2, 4  ;;  %s2505_s26 = smov [#allocation3]   ;;  %s47_s25 = int_to_ptr.hbm [resolvable:$true] %s46_s25 }
   0xb   :  { %s27_s27 = sshll.u32 %s2505_s26, 4  ;;  %s2506_s4 = smov [#allocation8]   ;;  %s28_s27 = int_to_ptr.vmem [resolvable:$true] %s27_s27 }
   0xc   :  { %30 = dma.hbm_to_vmem [thread:$0]  %s26_s21, 1024, %s28_s27, [#allocation4]  }
   0xd   :  { %s48_s28 = sshll.u32 %s2506_s4, 4  ;;  %s76_s0 = sshll.u32 %s2599_s6, 4  ;;  %s49_s28 = int_to_ptr.vmem [resolvable:$true] %s48_s28  ;;  %s77_s0 = int_to_ptr.hbm [resolvable:$true] %s76_s0 }
   0xe   :  { %54 = dma.hbm_to_vmem [thread:$0]  %s47_s25, 8192, %s49_s28, [#allocation7], %s2503_s1, %s2503_s1, %s2504_s22  }
   0xf   :  { %s2507_s10 = smov [#allocation11]  }
  0x10   :  { %s78_s11 = sshll.u32 %s2507_s10, 4  ;;  %s79_s11 = int_to_ptr.vmem [resolvable:$true] %s78_s11 }
  0x11   :  { %84 = dma.hbm_to_vmem [thread:$0]  %s77_s0, 1024, %s79_s11, [#allocation10], %s2503_s1, %s2503_s1, %s2504_s22  }
  0x12   :  { %2491 = dma.done.wait [#allocation4], 1024  }
  0x13   :  { %2492 = vsyncadd [#allocation4], 4294966272 }
  0x14   :  { %2493 = dma.done.wait [#allocation7], 9216  }
  0x15   :  { %2494 = vsyncadd [#allocation7], 4294958080 }
  0x16   :  { %2495 = dma.done.wait [#allocation10], 2048  }
  0x17   :  { %2496 = vsyncadd [#allocation10], 4294965248  ;;  %v2173_v0 = vld [vmem:[#allocation8 + $0x38] sm:$0xff]  ;;  %v2172_v4 = vld [vmem:[#allocation8 + $0x30] sm:$0xff]  ;;  %s2508_s17 = smov [#allocation12]   ;;  %s1562_s21 = sshll.u32 %s2601_s8, 4  ;;  %s1563_s21 = int_to_ptr.hbm [resolvable:$true] %s1562_s21 }
  0x18   :  { %v2181_v1 = vld [vmem:[#allocation8 + $0x78] sm:$0xff]  ;;  %639 = vmatpush.bf16.msra.mxu0 %v2173_v0  ;;  %v2180_v5 = vld [vmem:[#allocation8 + $0x70] sm:$0xff]  ;;  %v2171_v8 = vld [vmem:[#allocation8 + $0x28] sm:$0xff]  ;;  %s1560_s18 = sshll.u32 %s2508_s17, 4  ;;  %s1573_s24 = sshll.u32 %s2602_s9, 4  ;;  %s1561_s18 = int_to_ptr.vmem [resolvable:$true] %s1560_s18  ;;  %s1574_s24 = int_to_ptr.hbm [resolvable:$true] %s1573_s24 }
  0x19   :  { %v2189_v2 = vld [vmem:[#allocation8 + $0xb8] sm:$0xff]  ;;  %652 = vmatpush.bf16.msra.mxu1 %v2181_v1  ;;  %v2188_v6 = vld [vmem:[#allocation8 + $0xb0] sm:$0xff]  ;;  %v2179_v9 = vld [vmem:[#allocation8 + $0x68] sm:$0xff] }
  0x1a   :  { %v2197_v3 = vld [vmem:[#allocation8 + $0xf8] sm:$0xff]  ;;  %665 = vmatpush.bf16.msra.mxu2 %v2189_v2  ;;  %v2196_v7 = vld [vmem:[#allocation8 + $0xf0] sm:$0xff]  ;;  %v2187_v10 = vld [vmem:[#allocation8 + $0xa8] sm:$0xff] }
  0x1b   :  { %678 = vmatpush.bf16.msra.mxu3 %v2197_v3  ;;  %v2195_v11 = vld [vmem:[#allocation8 + $0xe8] sm:$0xff]  ;;  %v2170_v12 = vld [vmem:[#allocation8 + $0x20] sm:$0xff]  ;;  %v2169_v16 = vld [vmem:[#allocation8 + $0x18] sm:$0xff] }
  0x1c   :  { %640 = vmatpush.bf16.msra.mxu0 %v2172_v4  ;;  %v2178_v13 = vld [vmem:[#allocation8 + $0x60] sm:$0xff]  ;;  %v2177_v17 = vld [vmem:[#allocation8 + $0x58] sm:$0xff]  ;;  %v2168_v20 = vld [vmem:[#allocation8 + $0x10] sm:$0xff] }
  0x1d   :  { %653 = vmatpush.bf16.msra.mxu1 %v2180_v5  ;;  %v2186_v14 = vld [vmem:[#allocation8 + $0xa0] sm:$0xff]  ;;  %v2185_v18 = vld [vmem:[#allocation8 + $0x98] sm:$0xff]  ;;  %v2176_v21 = vld [vmem:[#allocation8 + $0x50] sm:$0xff] }
  0x1e   :  { %666 = vmatpush.bf16.msra.mxu2 %v2188_v6  ;;  %v2194_v15 = vld [vmem:[#allocation8 + $0xe0] sm:$0xff]  ;;  %v2193_v19 = vld [vmem:[#allocation8 + $0xd8] sm:$0xff]  ;;  %v2184_v22 = vld [vmem:[#allocation8 + $0x90] sm:$0xff] }
  0x1f   :  { %679 = vmatpush.bf16.msra.mxu3 %v2196_v7  ;;  %v2192_v23 = vld [vmem:[#allocation8 + $0xd0] sm:$0xff]  ;;  %v2167_v24 = vld [vmem:[#allocation8 + $0x8] sm:$0xff]  ;;  %v2166_v28 = vld [vmem:[#allocation8] sm:$0xff] }
  0x20   :  { %641 = vmatpush.bf16.msra.mxu0 %v2171_v8  ;;  %v2175_v25 = vld [vmem:[#allocation8 + $0x48] sm:$0xff]  ;;  %v2174_v29 = vld [vmem:[#allocation8 + $0x40] sm:$0xff]  ;;  %v2205_v32 = vld [vmem:[#allocation8 + $0x138] sm:$0xff] }
  0x21   :  { %654 = vmatpush.bf16.msra.mxu1 %v2179_v9  ;;  %v2183_v26 = vld [vmem:[#allocation8 + $0x88] sm:$0xff]  ;;  %v2182_v30 = vld [vmem:[#allocation8 + $0x80] sm:$0xff]  ;;  %v109_v33 = vld [vmem:[#allocation3 + $0x10] sm:$0xff] }
  0x22   :  { %667 = vmatpush.bf16.msra.mxu2 %v2187_v10  ;;  %v2191_v27 = vld [vmem:[#allocation8 + $0xc8] sm:$0xff]  ;;  %v2190_v31 = vld [vmem:[#allocation8 + $0xc0] sm:$0xff]  ;;  %v2213_v35 = vld [vmem:[#allocation8 + $0x178] sm:$0xff]  ;;  %v117_v40 = vpack.c.bf16 %v109_v33, %v109_v33 }
  0x23   :  { %680 = vmatpush.bf16.msra.mxu3 %v2195_v11  ;;  %v107_v34 = vld [vmem:[#allocation3] sm:$0xff]  ;;  %v110_v36 = vld [vmem:[#allocation3 + $0x18] sm:$0xff]  ;;  %v108_v37 = vld [vmem:[#allocation3 + $0x8] sm:$0xff] }
  0x24   :  { %642 = vmatpush.bf16.msra.mxu0 %v2170_v12  ;;  %v2221_v38 = vld [vmem:[#allocation8 + $0x1b8] sm:$0xff]  ;;  %v115_v41 = vpack.c.bf16 %v107_v34, %v107_v34  ;;  %v118_v42 = vpack.c.bf16 %v110_v36, %v110_v36  ;;  %v116_v43 = vpack.c.bf16 %v108_v37, %v108_v37  ;;  %v2204_v44 = vld [vmem:[#allocation8 + $0x130] sm:$0xff]  ;;  %v2203_v48 = vld [vmem:[#allocation8 + $0x128] sm:$0xff] }
  0x25   :  { %655 = vmatpush.bf16.msra.mxu1 %v2178_v13  ;;  %v2229_v39 = vld [vmem:[#allocation8 + $0x1f8] sm:$0xff]  ;;  %v2212_v45 = vld [vmem:[#allocation8 + $0x170] sm:$0xff]  ;;  %v2211_v49 = vld [vmem:[#allocation8 + $0x168] sm:$0xff] }
  0x26   :  { %668 = vmatpush.bf16.msra.mxu2 %v2186_v14  ;;  %v2220_v46 = vld [vmem:[#allocation8 + $0x1b0] sm:$0xff]  ;;  %v2219_v50 = vld [vmem:[#allocation8 + $0x1a8] sm:$0xff]  ;;  %v2202_v52 = vld [vmem:[#allocation8 + $0x120] sm:$0xff] }
  0x27   :  { %681 = vmatpush.bf16.msra.mxu3 %v2194_v15  ;;  %v2228_v47 = vld [vmem:[#allocation8 + $0x1f0] sm:$0xff]  ;;  %v2227_v51 = vld [vmem:[#allocation8 + $0x1e8] sm:$0xff]  ;;  %v2210_v53 = vld [vmem:[#allocation8 + $0x160] sm:$0xff] }
  0x28   :  { %643 = vmatpush.bf16.msra.mxu0 %v2169_v16  ;;  %v2218_v54 = vld [vmem:[#allocation8 + $0x1a0] sm:$0xff]  ;;  %v2201_v56 = vld [vmem:[#allocation8 + $0x118] sm:$0xff]  ;;  %v2200_v60 = vld [vmem:[#allocation8 + $0x110] sm:$0xff] }
  0x29   :  { %656 = vmatpush.bf16.msra.mxu1 %v2177_v17  ;;  %v2226_v55 = vld [vmem:[#allocation8 + $0x1e0] sm:$0xff]  ;;  %v2209_v57 = vld [vmem:[#allocation8 + $0x158] sm:$0xff]  ;;  %v2208_v61 = vld [vmem:[#allocation8 + $0x150] sm:$0xff] }
  0x2a   :  { %669 = vmatpush.bf16.msra.mxu2 %v2185_v18  ;;  %v2217_v58 = vld [vmem:[#allocation8 + $0x198] sm:$0xff]  ;;  %v2216_v62 = vld [vmem:[#allocation8 + $0x190] sm:$0xff]  ;;  %v2199_v0 = vld [vmem:[#allocation8 + $0x108] sm:$0xff] }
  0x2b   :  { %682 = vmatpush.bf16.msra.mxu3 %v2193_v19  ;;  %v2225_v59 = vld [vmem:[#allocation8 + $0x1d8] sm:$0xff]  ;;  %v2224_v63 = vld [vmem:[#allocation8 + $0x1d0] sm:$0xff]  ;;  %v2207_v1 = vld [vmem:[#allocation8 + $0x148] sm:$0xff] }
  0x2c   :  { %644 = vmatpush.bf16.msra.mxu0 %v2168_v20  ;;  %v2215_v2 = vld [vmem:[#allocation8 + $0x188] sm:$0xff]  ;;  %v2198_v4 = vld [vmem:[#allocation8 + $0x100] sm:$0xff]  ;;  %v2237_v8 = vld [vmem:[#allocation8 + $0x38] sm:$0xff] }
  0x2d   :  { %657 = vmatpush.bf16.msra.mxu1 %v2176_v21  ;;  %v2223_v3 = vld [vmem:[#allocation8 + $0x1c8] sm:$0xff]  ;;  %v2206_v5 = vld [vmem:[#allocation8 + $0x140] sm:$0xff]  ;;  %v113_v9 = vld [vmem:[#allocation3 + $0x30] sm:$0xff] }
  0x2e   :  { %670 = vmatpush.bf16.msra.mxu2 %v2184_v22  ;;  %v2214_v6 = vld [vmem:[#allocation8 + $0x180] sm:$0xff]  ;;  %v2245_v11 = vld [vmem:[#allocation8 + $0x78] sm:$0xff]  ;;  %v112_v13 = vld [vmem:[#allocation3 + $0x28] sm:$0xff]  ;;  %v121_v16 = vpack.c.bf16 %v113_v9, %v113_v9 }
  0x2f   :  { %683 = vmatpush.bf16.msra.mxu3 %v2192_v23  ;;  %v2222_v7 = vld [vmem:[#allocation8 + $0x1c0] sm:$0xff]  ;;  %v114_v12 = vld [vmem:[#allocation3 + $0x38] sm:$0xff]  ;;  %v120_v19 = vpack.c.bf16 %v112_v13, %v112_v13  ;;  %v2236_v20 = vld [vmem:[#allocation8 + $0x30] sm:$0xff] }
  0x30   :  { %645 = vmatpush.bf16.msra.mxu0 %v2167_v24  ;;  %v111_v10 = vld [vmem:[#allocation3 + $0x20] sm:$0xff]  ;;  %v2253_v14 = vld [vmem:[#allocation8 + $0xb8] sm:$0xff]  ;;  %v122_v18 = vpack.c.bf16 %v114_v12, %v114_v12  ;;  %v2244_v21 = vld [vmem:[#allocation8 + $0x70] sm:$0xff] }
  0x31   :  { %658 = vmatpush.bf16.msra.mxu1 %v2175_v25  ;;  %v2261_v15 = vld [vmem:[#allocation8 + $0xf8] sm:$0xff]  ;;  %v119_v17 = vpack.c.bf16 %v111_v10, %v111_v10  ;;  %v2252_v22 = vld [vmem:[#allocation8 + $0xb0] sm:$0xff]  ;;  %v2235_v24 = vld [vmem:[#allocation8 + $0x28] sm:$0xff] }
  0x32   :  { %671 = vmatpush.bf16.msra.mxu2 %v2183_v26  ;;  %v2260_v23 = vld [vmem:[#allocation8 + $0xf0] sm:$0xff]  ;;  %v2243_v25 = vld [vmem:[#allocation8 + $0x68] sm:$0xff]  ;;  %v2241_v33 = vld [vmem:[#allocation8 + $0x58] sm:$0xff] }
  0x33   :  { %684 = vmatpush.bf16.msra.mxu3 %v2191_v27  ;;  %v2251_v26 = vld [vmem:[#allocation8 + $0xa8] sm:$0xff]  ;;  %v2249_v34 = vld [vmem:[#allocation8 + $0x98] sm:$0xff]  ;;  %v2232_v36 = vld [vmem:[#allocation8 + $0x10] sm:$0xff] }
  0x34   :  { %646 = vmatpush.bf16.msra.mxu0 %v2166_v28  ;;  %v2259_v27 = vld [vmem:[#allocation8 + $0xe8] sm:$0xff]  ;;  %v2234_v28 = vld [vmem:[#allocation8 + $0x20] sm:$0xff]  ;;  %v2240_v37 = vld [vmem:[#allocation8 + $0x50] sm:$0xff] }
  0x35   :  { %659 = vmatpush.bf16.msra.mxu1 %v2174_v29  ;;  %v2242_v29 = vld [vmem:[#allocation8 + $0x60] sm:$0xff]  ;;  %v2273_v9 = vld [vmem:[#allocation8 + $0x158] sm:$0xff]  ;;  %v2264_v12 = vld [vmem:[#allocation8 + $0x110] sm:$0xff] }
  0x36   :  { %672 = vmatpush.bf16.msra.mxu2 %v2182_v30  ;;  %v2250_v30 = vld [vmem:[#allocation8 + $0xa0] sm:$0xff]  ;;  %v2281_v10 = vld [vmem:[#allocation8 + $0x198] sm:$0xff]  ;;  %v2272_v13 = vld [vmem:[#allocation8 + $0x150] sm:$0xff] }
  0x37   :  { %685 = vmatpush.bf16.msra.mxu3 %v2190_v31  ;;  %647 = vmatmul.bf16.vlgmr.msra.gmra.mxu0 %v115_v41  ;;  %v2258_v31 = vld [vmem:[#allocation8 + $0xe0] sm:$0xff]  ;;  %v2239_v41 = vld [vmem:[#allocation8 + $0x48] sm:$0xff] }
  0x38   :  { %691 = vmatpush.bf16.msrb.mxu0 %v2205_v32  ;;  %660 = vmatmul.bf16.vlgmr.msra.gmra.mxu1 %v116_v43  ;;  %v2233_v32 = vld [vmem:[#allocation8 + $0x18] sm:$0xff]  ;;  %v2255_v43 = vld [vmem:[#allocation8 + $0xc8] sm:$0xff] }
  0x39   :  { %704 = vmatpush.bf16.msrb.mxu1 %v2213_v35  ;;  %673 = vmatmul.bf16.vlgmr.msra.gmra.mxu2 %v117_v40  ;;  %v2257_v35 = vld [vmem:[#allocation8 + $0xd8] sm:$0xff]  ;;  %v2231_v40 = vld [vmem:[#allocation8 + $0x8] sm:$0xff] }
  0x3a   :  { %717 = vmatpush.bf16.msrb.mxu2 %v2221_v38  ;;  %686 = vmatmul.bf16.vlgmr.msra.gmra.mxu3 %v118_v42  ;;  %v2248_v38 = vld [vmem:[#allocation8 + $0x90] sm:$0xff]  ;;  %v2247_v42 = vld [vmem:[#allocation8 + $0x88] sm:$0xff] }
  0x3b   :  { %730 = vmatpush.bf16.msrb.mxu3 %v2229_v39  ;;  %v2256_v39 = vld [vmem:[#allocation8 + $0xd0] sm:$0xff] }
  0x3c   :  { %692 = vmatpush.bf16.msrb.mxu0 %v2204_v44  ;;  %v2230_v44 = vld [vmem:[#allocation8] sm:$0xff] }
  0x3d   :  { %705 = vmatpush.bf16.msrb.mxu1 %v2212_v45  ;;  %v2238_v45 = vld [vmem:[#allocation8 + $0x40] sm:$0xff] }
  0x3e   :  { %718 = vmatpush.bf16.msrb.mxu2 %v2220_v46  ;;  %v2246_v46 = vld [vmem:[#allocation8 + $0x80] sm:$0xff] }
  0x3f   :  { %731 = vmatpush.bf16.msrb.mxu3 %v2228_v47  ;;  %v2254_v47 = vld [vmem:[#allocation8 + $0xc0] sm:$0xff] }
  0x40   :  { %693 = vmatpush.bf16.msrb.mxu0 %v2203_v48  ;;  %v2269_v48 = vld [vmem:[#allocation8 + $0x138] sm:$0xff] }
  0x41   :  { %706 = vmatpush.bf16.msrb.mxu1 %v2211_v49  ;;  %v747_v49 = vld [vmem:[#allocation6 + $0x10] sm:$0xff] }
  0x42   :  { %719 = vmatpush.bf16.msrb.mxu2 %v2219_v50  ;;  %v745_v50 = vld [vmem:[#allocation6] sm:$0xff] }
  0x43   :  { %732 = vmatpush.bf16.msrb.mxu3 %v2227_v51  ;;  %v2277_v51 = vld [vmem:[#allocation8 + $0x178] sm:$0xff] }
  0x44   :  { %694 = vmatpush.bf16.msrb.mxu0 %v2202_v52  ;;  %v748_v52 = vld [vmem:[#allocation6 + $0x18] sm:$0xff] }
  0x45   :  { %707 = vmatpush.bf16.msrb.mxu1 %v2210_v53  ;;  %v746_v53 = vld [vmem:[#allocation6 + $0x8] sm:$0xff] }
  0x46   :  { %720 = vmatpush.bf16.msrb.mxu2 %v2218_v54  ;;  %v2285_v54 = vld [vmem:[#allocation8 + $0x1b8] sm:$0xff] }
  0x47   :  { %733 = vmatpush.bf16.msrb.mxu3 %v2226_v55  ;;  %v2293_v55 = vld [vmem:[#allocation8 + $0x1f8] sm:$0xff] }
  0x48   :  { %695 = vmatpush.bf16.msrb.mxu0 %v2201_v56  ;;  %v755_v56 = vpack.c.bf16 %v747_v49, %v747_v49  ;;  %v2301_v49 = vld [vmem:[#allocation9 + $0x38] sm:$0xff] }
  0x49   :  { %708 = vmatpush.bf16.msrb.mxu1 %v2209_v57  ;;  %v753_v57 = vpack.c.bf16 %v745_v50, %v745_v50 }
  0x4a   :  { %721 = vmatpush.bf16.msrb.mxu2 %v2217_v58  ;;  %v756_v58 = vpack.c.bf16 %v748_v52, %v748_v52  ;;  %v2300_v52 = vld [vmem:[#allocation9 + $0x30] sm:$0xff] }
  0x4b   :  { %734 = vmatpush.bf16.msrb.mxu3 %v2225_v59  ;;  %v754_v59 = vpack.c.bf16 %v746_v53, %v746_v53  ;;  %v2299_v53 = vld [vmem:[#allocation9 + $0x28] sm:$0xff] }
  0x4c   :  { %696 = vmatpush.bf16.msrb.mxu0 %v2200_v60  ;;  %v2268_v60 = vld [vmem:[#allocation8 + $0x130] sm:$0xff] }
  0x4d   :  { %709 = vmatpush.bf16.msrb.mxu1 %v2208_v61  ;;  %v2276_v61 = vld [vmem:[#allocation8 + $0x170] sm:$0xff] }
  0x4e   :  { %722 = vmatpush.bf16.msrb.mxu2 %v2216_v62  ;;  %v2284_v62 = vld [vmem:[#allocation8 + $0x1b0] sm:$0xff] }
  0x4f   :  { %735 = vmatpush.bf16.msrb.mxu3 %v2224_v63  ;;  %v2292_v63 = vld [vmem:[#allocation8 + $0x1f0] sm:$0xff] }
  0x50   :  { %697 = vmatpush.bf16.msrb.mxu0 %v2199_v0  ;;  %v2267_v0 = vld [vmem:[#allocation8 + $0x128] sm:$0xff] }
  0x51   :  { %710 = vmatpush.bf16.msrb.mxu1 %v2207_v1  ;;  %v2275_v1 = vld [vmem:[#allocation8 + $0x168] sm:$0xff] }
  0x52   :  { %723 = vmatpush.bf16.msrb.mxu2 %v2215_v2  ;;  %v2283_v2 = vld [vmem:[#allocation8 + $0x1a8] sm:$0xff] }
  0x53   :  { %736 = vmatpush.bf16.msrb.mxu3 %v2223_v3  ;;  %v2291_v3 = vld [vmem:[#allocation8 + $0x1e8] sm:$0xff] }
  0x54   :  { %698 = vmatpush.bf16.msrb.mxu0 %v2198_v4  ;;  %v2266_v4 = vld [vmem:[#allocation8 + $0x120] sm:$0xff] }
  0x55   :  { %711 = vmatpush.bf16.msrb.mxu1 %v2206_v5  ;;  %v2274_v5 = vld [vmem:[#allocation8 + $0x160] sm:$0xff] }
  0x56   :  { %724 = vmatpush.bf16.msrb.mxu2 %v2214_v6  ;;  %v2282_v6 = vld [vmem:[#allocation8 + $0x1a0] sm:$0xff] }
  0x57   :  { %737 = vmatpush.bf16.msrb.mxu3 %v2222_v7  ;;  %699 = vmatmul.bf16.vlgmr.msrb.gmra.mxu0 %v119_v17  ;;  %v2290_v7 = vld [vmem:[#allocation8 + $0x1e0] sm:$0xff]  ;;  %v2271_v17 = vld [vmem:[#allocation8 + $0x148] sm:$0xff] }
  0x58   :  { %1277 = vmatpush.bf16.msra.mxu0 %v2237_v8  ;;  %712 = vmatmul.bf16.vlgmr.msrb.gmra.mxu1 %v120_v19  ;;  %v2265_v8 = vld [vmem:[#allocation8 + $0x118] sm:$0xff]  ;;  %v2287_v19 = vld [vmem:[#allocation8 + $0x1c8] sm:$0xff] }
  0x59   :  { %1290 = vmatpush.bf16.msra.mxu1 %v2245_v11  ;;  %725 = vmatmul.bf16.vlgmr.msrb.gmra.mxu2 %v121_v16  ;;  %v2289_v11 = vld [vmem:[#allocation8 + $0x1d8] sm:$0xff]  ;;  %v2263_v16 = vld [vmem:[#allocation8 + $0x108] sm:$0xff] }
  0x5a   :  { %1303 = vmatpush.bf16.msra.mxu2 %v2253_v14  ;;  %738 = vmatmul.bf16.vlgmr.msrb.gmra.mxu3 %v122_v18  ;;  %v2280_v14 = vld [vmem:[#allocation8 + $0x190] sm:$0xff]  ;;  %v2279_v18 = vld [vmem:[#allocation8 + $0x188] sm:$0xff] }
  0x5b   :  { %1316 = vmatpush.bf16.msra.mxu3 %v2261_v15  ;;  %v2288_v15 = vld [vmem:[#allocation8 + $0x1d0] sm:$0xff] }
  0x5c   :  { %1278 = vmatpush.bf16.msra.mxu0 %v2236_v20  ;;  %v2262_v20 = vld [vmem:[#allocation8 + $0x100] sm:$0xff] }
  0x5d   :  { %1291 = vmatpush.bf16.msra.mxu1 %v2244_v21  ;;  %v2270_v21 = vld [vmem:[#allocation8 + $0x140] sm:$0xff] }
  0x5e   :  { %1304 = vmatpush.bf16.msra.mxu2 %v2252_v22  ;;  %v2278_v22 = vld [vmem:[#allocation8 + $0x180] sm:$0xff] }
  0x5f   :  { %1317 = vmatpush.bf16.msra.mxu3 %v2260_v23  ;;  %v749_v23 = vld [vmem:[#allocation6 + $0x20] sm:$0xff] }
  0x60   :  { %1279 = vmatpush.bf16.msra.mxu0 %v2235_v24  ;;  %v750_v24 = vld [vmem:[#allocation6 + $0x28] sm:$0xff] }
  0x61   :  { %1292 = vmatpush.bf16.msra.mxu1 %v2243_v25  ;;  %v2286_v25 = vld [vmem:[#allocation8 + $0x1c0] sm:$0xff] }
  0x62   :  { %1305 = vmatpush.bf16.msra.mxu2 %v2251_v26  ;;  %v751_v26 = vld [vmem:[#allocation6 + $0x30] sm:$0xff] }
  0x63   :  { %1318 = vmatpush.bf16.msra.mxu3 %v2259_v27  ;;  %v752_v27 = vld [vmem:[#allocation6 + $0x38] sm:$0xff] }
  0x64   :  { %1280 = vmatpush.bf16.msra.mxu0 %v2234_v28  ;;  %v757_v28 = vpack.c.bf16 %v749_v23, %v749_v23 }
  0x65   :  { %1293 = vmatpush.bf16.msra.mxu1 %v2242_v29  ;;  %v758_v29 = vpack.c.bf16 %v750_v24, %v750_v24 }
  0x66   :  { %1306 = vmatpush.bf16.msra.mxu2 %v2250_v30  ;;  %v759_v30 = vpack.c.bf16 %v751_v26, %v751_v26 }
  0x67   :  { %1319 = vmatpush.bf16.msra.mxu3 %v2258_v31  ;;  %v760_v31 = vpack.c.bf16 %v752_v27, %v752_v27 }
  0x68   :  { %1281 = vmatpush.bf16.msra.mxu0 %v2233_v32  ;;  %v2319_v32 = vld [vmem:[%s2596_s3] ss:$0 sm:$0xff] }
  0x69   :  { %1294 = vmatpush.bf16.msra.mxu1 %v2241_v33 }
  0x6a   :  { %1307 = vmatpush.bf16.msra.mxu2 %v2249_v34 }
  0x6b   :  { %1320 = vmatpush.bf16.msra.mxu3 %v2257_v35 }
  0x6c   :  { %1282 = vmatpush.bf16.msra.mxu0 %v2232_v36 }
  0x6d   :  { %1295 = vmatpush.bf16.msra.mxu1 %v2240_v37 }
  0x6e   :  { %1308 = vmatpush.bf16.msra.mxu2 %v2248_v38 }
  0x6f   :  { %1321 = vmatpush.bf16.msra.mxu3 %v2256_v39 }
  0x70   :  { %1283 = vmatpush.bf16.msra.mxu0 %v2231_v40 }
  0x71   :  { %1296 = vmatpush.bf16.msra.mxu1 %v2239_v41 }
  0x72   :  { %1309 = vmatpush.bf16.msra.mxu2 %v2247_v42 }
  0x73   :  { %1322 = vmatpush.bf16.msra.mxu3 %v2255_v43 }
  0x74   :  { %1284 = vmatpush.bf16.msra.mxu0 %v2230_v44 }
  0x75   :  { %1297 = vmatpush.bf16.msra.mxu1 %v2238_v45 }
  0x76   :  { %1310 = vmatpush.bf16.msra.mxu2 %v2246_v46 }
  0x77   :  { %1323 = vmatpush.bf16.msra.mxu3 %v2254_v47  ;;  %1285 = vmatmul.bf16.vlgmr.msra.gmra.mxu0 %v753_v57  ;;  %v2297_v57 = vld [vmem:[#allocation9 + $0x18] sm:$0xff] }
  0x78   :  { %1329 = vmatpush.bf16.msrb.mxu0 %v2269_v48  ;;  %1298 = vmatmul.bf16.vlgmr.msra.gmra.mxu1 %v754_v59  ;;  %v2296_v59 = vld [vmem:[#allocation9 + $0x10] sm:$0xff] }
  0x79   :  { %1342 = vmatpush.bf16.msrb.mxu1 %v2277_v51  ;;  %1311 = vmatmul.bf16.vlgmr.msra.gmra.mxu2 %v755_v56  ;;  %v2298_v56 = vld [vmem:[#allocation9 + $0x20] sm:$0xff] }
  0x7a   :  { %1355 = vmatpush.bf16.msrb.mxu2 %v2285_v54  ;;  %1324 = vmatmul.bf16.vlgmr.msra.gmra.mxu3 %v756_v58 }
  0x7b   :  { %1368 = vmatpush.bf16.msrb.mxu3 %v2293_v55 }
  0x7c   :  { %1330 = vmatpush.bf16.msrb.mxu0 %v2268_v60 }
  0x7d   :  { %1343 = vmatpush.bf16.msrb.mxu1 %v2276_v61  ;;  %v2295_v61 = vld [vmem:[#allocation9 + $0x8] sm:$0xff] }
  0x7e   :  { %1356 = vmatpush.bf16.msrb.mxu2 %v2284_v62 }
  0x7f   :  { %1369 = vmatpush.bf16.msrb.mxu3 %v2292_v63 }
  0x80   :  { %1331 = vmatpush.bf16.msrb.mxu0 %v2267_v0 }
  0x81   :  { %1344 = vmatpush.bf16.msrb.mxu1 %v2275_v1  ;;  %v2294_v1 = vld [vmem:[#allocation9] sm:$0xff] }
  0x82   :  { %1357 = vmatpush.bf16.msrb.mxu2 %v2283_v2 }
  0x83   :  { %1370 = vmatpush.bf16.msrb.mxu3 %v2291_v3  ;;  %v2320_v3 = vld [vmem:[%s2596_s3] ss:$0 sm:$0xff] }
  0x84   :  { %1332 = vmatpush.bf16.msrb.mxu0 %v2266_v4  ;;  %v2309_v4 = vld [vmem:[#allocation11 + $0x38] sm:$0xff] }
  0x85   :  { %1345 = vmatpush.bf16.msrb.mxu1 %v2274_v5 }
  0x86   :  { %1358 = vmatpush.bf16.msrb.mxu2 %v2282_v6 }
  0x87   :  { %1371 = vmatpush.bf16.msrb.mxu3 %v2290_v7  ;;  %v2308_v7 = vld [vmem:[#allocation11 + $0x30] sm:$0xff] }
  0x88   :  { %1333 = vmatpush.bf16.msrb.mxu0 %v2265_v8 }
  0x89   :  { %1346 = vmatpush.bf16.msrb.mxu1 %v2273_v9  ;;  %v2307_v9 = vld [vmem:[#allocation11 + $0x28] sm:$0xff] }
  0x8a   :  { %1359 = vmatpush.bf16.msrb.mxu2 %v2281_v10 }
  0x8b   :  { %1372 = vmatpush.bf16.msrb.mxu3 %v2289_v11  ;;  %v2306_v11 = vld [vmem:[#allocation11 + $0x20] sm:$0xff] }
  0x8c   :  { %1334 = vmatpush.bf16.msrb.mxu0 %v2264_v12 }
  0x8d   :  { %1347 = vmatpush.bf16.msrb.mxu1 %v2272_v13 }
  0x8e   :  { %1360 = vmatpush.bf16.msrb.mxu2 %v2280_v14 }
  0x8f   :  { %1373 = vmatpush.bf16.msrb.mxu3 %v2288_v15 }
  0x90   :  { %1335 = vmatpush.bf16.msrb.mxu0 %v2263_v16 }
  0x91   :  { %1348 = vmatpush.bf16.msrb.mxu1 %v2271_v17 }
  0x92   :  { %1361 = vmatpush.bf16.msrb.mxu2 %v2279_v18 }
  0x93   :  { %1374 = vmatpush.bf16.msrb.mxu3 %v2287_v19 }
  0x94   :  { %1336 = vmatpush.bf16.msrb.mxu0 %v2262_v20 }
  0x95   :  { %1349 = vmatpush.bf16.msrb.mxu1 %v2270_v21 }
  0x96   :  { %1362 = vmatpush.bf16.msrb.mxu2 %v2278_v22 }
  0x97   :  { %1375 = vmatpush.bf16.msrb.mxu3 %v2286_v25  ;;  %1337 = vmatmul.bf16.vlgmr.msrb.gmra.mxu0 %v757_v28 }
  0x98   :  { %1350 = vmatmul.bf16.vlgmr.msrb.gmra.mxu1 %v758_v29  ;;  %1454 = vmatpush.bf16.msra.mxu0 %v2301_v49 }
  0x99   :  { %1363 = vmatmul.bf16.vlgmr.msrb.gmra.mxu2 %v759_v30  ;;  %1539 = vmatpush.bf16.msra.mxu1 %v2309_v4 }
  0x9a   :  { %1376 = vmatmul.bf16.vlgmr.msrb.gmra.mxu3 %v760_v31 }
  0x9c   :  { %1455 = vmatpush.bf16.msra.mxu0 %v2300_v52 }
  0x9d   :  { %1540 = vmatpush.bf16.msra.mxu1 %v2308_v7 }
  0xa0   :  { %1456 = vmatpush.bf16.msra.mxu0 %v2299_v53 }
  0xa1   :  { %1541 = vmatpush.bf16.msra.mxu1 %v2307_v9 }
  0xa4   :  { %1457 = vmatpush.bf16.msra.mxu0 %v2298_v56 }
  0xa5   :  { %1542 = vmatpush.bf16.msra.mxu1 %v2306_v11 }
  0xa8   :  { %1458 = vmatpush.bf16.msra.mxu0 %v2297_v57 }
  0xac   :  { %1459 = vmatpush.bf16.msra.mxu0 %v2296_v59 }
  0xb0   :  { %1460 = vmatpush.bf16.msra.mxu0 %v2295_v61 }
  0xb4   :  { %v648_v33 = vpop.f32.mrf.mxu0  ;;  %1461 = vmatpush.bf16.msra.mxu0 %v2294_v1 }
  0xb5   :  { %v649_v34 = vadd.f32 %v2319_v32, %v648_v33  ;;  %v661_v35 = vpop.f32.mrf.mxu1  ;;  %v2305_v33 = vld [vmem:[#allocation11 + $0x18] sm:$0xff] }
  0xb6   :  { %1543 = vmatpush.bf16.msra.mxu1 %v2305_v33 }
  0xb7   :  { %v662_v36 = vadd.f32 %v661_v35, %v649_v34  ;;  %v2304_v34 = vld [vmem:[#allocation11 + $0x10] sm:$0xff]  ;;  %v2303_v35 = vld [vmem:[#allocation11 + $0x8] sm:$0xff] }
  0xba   :  { %1544 = vmatpush.bf16.msra.mxu1 %v2304_v34 }
  0xbc   :  { %v674_v37 = vpop.f32.mrf.mxu2  ;;  %v650_v40 = vpop.f32.mrf.mxu0 }
  0xbd   :  { %v675_v38 = vadd.f32 %v674_v37, %v662_v36  ;;  %v687_v39 = vpop.f32.mrf.mxu3  ;;  %v663_v42 = vpop.f32.mrf.mxu1  ;;  %v2302_v36 = vld [vmem:[#allocation11] sm:$0xff] }
  0xbe   :  { %1545 = vmatpush.bf16.msra.mxu1 %v2303_v35 }
  0xbf   :  { %v688_v41 = vadd.f32 %v687_v39, %v675_v38  ;;  %v2321_v38 = vld [vmem:[%s2598_s5] ss:$0 sm:$0xff]  ;;  %s2509_s5 = smov [#allocation13]  }
  0xc0   :  { %s1571_s1 = sshll.u32 %s2509_s5, 4  ;;  %s1572_s1 = int_to_ptr.vmem [resolvable:$true] %s1571_s1 }
  0xc2   :  { %1546 = vmatpush.bf16.msra.mxu1 %v2302_v36 }
  0xc4   :  { %v676_v43 = vpop.f32.mrf.mxu2 }
  0xc5   :  { %v689_v44 = vpop.f32.mrf.mxu3 }
  0xd4   :  { %v700_v45 = vpop.f32.mrf.mxu0 }
  0xd5   :  { %v713_v46 = vpop.f32.mrf.mxu1  ;;  %v701_v12 = vadd.f32 %v700_v45, %v688_v41  ;;  %v2322_v45 = vld [vmem:[%s2600_s7] ss:$0 sm:$0xff] }
  0xd7   :  { %v714_v14 = vadd.f32 %v713_v46, %v701_v12 }
  0xdc   :  { %v726_v47 = vpop.f32.mrf.mxu2  ;;  %v702_v50 = vpop.f32.mrf.mxu0 }
  0xdd   :  { %v739_v48 = vpop.f32.mrf.mxu3  ;;  %v715_v51 = vpop.f32.mrf.mxu1  ;;  %v727_v19 = vadd.f32 %v726_v47, %v714_v14 }
  0xdf   :  { %v740_v23 = vadd.f32 %v739_v48, %v727_v19 }
  0xe1   :  { %v743_v28 = vmax.f32 %v740_v23, 0.0 }
  0xe4   :  { %v728_v54 = vpop.f32.mrf.mxu2 }
  0xe5   :  { %v741_v55 = vpop.f32.mrf.mxu3 }
  0xf4   :  { %v1286_v58 = vpop.f32.mrf.mxu0 }
  0xf5   :  { %v1299_v60 = vpop.f32.mrf.mxu1  ;;  %v1287_v8 = vadd.f32 %v2320_v3, %v1286_v58 }
  0xf7   :  { %v1300_v10 = vadd.f32 %v1299_v60, %v1287_v8 }
  0xfc   :  { %v1312_v62 = vpop.f32.mrf.mxu2  ;;  %v1288_v0 = vpop.f32.mrf.mxu0 }
  0xfd   :  { %v1325_v63 = vpop.f32.mrf.mxu3  ;;  %v1301_v2 = vpop.f32.mrf.mxu1  ;;  %v1313_v13 = vadd.f32 %v1312_v62, %v1300_v10 }
  0xff   :  { %v1326_v15 = vadd.f32 %v1325_v63, %v1313_v13 }
 0x104   :  { %v1314_v5 = vpop.f32.mrf.mxu2 }
 0x105   :  { %v1327_v6 = vpop.f32.mrf.mxu3 }
 0x114   :  { %v1338_v16 = vpop.f32.mrf.mxu0 }
 0x115   :  { %v1351_v17 = vpop.f32.mrf.mxu1  ;;  %v1339_v18 = vadd.f32 %v1338_v16, %v1326_v15 }
 0x117   :  { %v1352_v20 = vadd.f32 %v1351_v17, %v1339_v18 }
 0x11c   :  { %v1364_v21 = vpop.f32.mrf.mxu2  ;;  %v1340_v25 = vpop.f32.mrf.mxu0 }
 0x11d   :  { %v1377_v22 = vpop.f32.mrf.mxu3  ;;  %v1365_v24 = vadd.f32 %v1364_v21, %v1352_v20  ;;  %v1353_v26 = vpop.f32.mrf.mxu1 }
 0x11f   :  { %v1378_v27 = vadd.f32 %v1377_v22, %v1365_v24 }
 0x121   :  { %v1381_v29 = vmax.f32 %v1378_v27, 0.0 }
 0x123   :  { %v1385_v30 = vpack.c.bf16 %v1381_v29, %v743_v28 }
 0x124   :  { %v1366_v31 = vpop.f32.mrf.mxu2 }
 0x125   :  { %v1379_v32 = vpop.f32.mrf.mxu3  ;;  %1462 = vmatmul.bf16.vlgmr.msra.gmra.mxu0 %v1385_v30 }
 0x1a2   :  { %v1463_v37 = vpop.f32.mrf.mxu0 }
 0x1a3   :  { %v1464_v39 = vadd.f32 %v2321_v38, %v1463_v37 }
 0x1a5   :  { %v1468_v42 = vmax.f32 %v1464_v39, 0.0 }
 0x1aa   :  { %v1465_v40 = vpop.f32.mrf.mxu0 }
 0x1ab   :  { %v1466_v41 = vadd.f32 %v2321_v38, %v1465_v40 }
 0x1ad   :  { %v1469_v43 = vmax.f32 %v1466_v41, 0.0 }
 0x1af   :  { %v1470_v44 = vpack.c.bf16 %v1469_v43, %v1468_v42 }
 0x1b1   :  { %1547 = vmatmul.bf16.vlgmr.msra.gmra.mxu1 %v1470_v44 }
 0x22e   :  { %v1548_v46 = vpop.f32.mrf.mxu1 }
 0x22f   :  { %v1549_v47 = vadd.f32 %v2322_v45, %v1548_v46 }
 0x231   :  { %1553 = vst [vmem:[#allocation12] sm:$0xff] %v1549_v47 }
 0x232   :  { %1565 = dma.vmem_to_hbm [thread:$0]  %s1561_s18, 128, %s1563_s21, [#allocation5]  }
 0x236   :  { %v1550_v48 = vpop.f32.mrf.mxu1 }
 0x237   :  { %v1551_v49 = vadd.f32 %v2322_v45, %v1550_v48 }
 0x239   :  { %1554 = vst [vmem:[#allocation13] sm:$0xff] %v1551_v49 }
 0x23a   :  { %1576 = dma.vmem_to_hbm [thread:$0]  %s1572_s1, 128, %s1574_s24, [#allocation14]  }
 0x23b   :  { %2497 = dma.done.wait [#allocation5], 128  }
 0x23c   :  { %2498 = vsyncadd [#allocation5], 4294967168 }
 0x23d   :  { %2499 = dma.done.wait [#allocation14], 128  }
 0x23e   :  { %2500 = vsyncadd [#allocation14], 4294967168 }
 0x23f   :  { %1585 = vsyncpa [#allocation4], 1 }
 0x240   :  { %1586 = vsyncpa [#allocation7], 1 }
 0x241   :  { %1587 = vsyncpa [#allocation10], 1 }
 0x242   :  { %1588 = vsyncpa [#allocation5], 1 }
 0x243   :  { %1589 = vsyncpa [#allocation14], 1 }

</bundles_post_ra>
